<compile_context>
chip_gen: v6e
topology: v6e:2x2x1
jax: 0.10.0
libtpu: 0.0.40
codegen_flags: <defaults>
</compile_context>

<pallas_src>
import functools
import math

import jax
import jax.numpy as jnp
from jax.experimental import pallas as pl
from jax.experimental.pallas import tpu as pltpu


# Matmul operand dtype: bf16 operands + f32 accumulation is MXU-native on
# v6e/v7x and halves weight DMA bytes.  Set to jnp.float32 for bit-exact f32.
MATMUL_DTYPE = jnp.bfloat16
LN_EPS = 1e-5  # torch.nn.LayerNorm default

_COMPILER_PARAMS = pltpu.CompilerParams(
    dimension_semantics=("parallel",),          # batch axis → both TCs on v7x
    vmem_limit_bytes=32 * 1024 * 1024,          # explicit scoped-VMEM budget
)


# ----------------------------------------------------------------------------
# In-kernel helpers
# ----------------------------------------------------------------------------

def _mm(a, b):
    """MXU matmul: bf16 (or f32) operands, f32 accumulation."""
    return jnp.dot(a.astype(MATMUL_DTYPE), b.astype(MATMUL_DTYPE),
                   preferred_element_type=jnp.float32)


def _residual_layernorm(x, y, gamma, beta):
    """LayerNorm(x + y) with f32 statistics."""
    z = x + y
    mean = jnp.mean(z, axis=-1, keepdims=True)
    var = jnp.mean(jnp.square(z - mean), axis=-1, keepdims=True)
    zn = (z - mean) * jax.lax.rsqrt(var + LN_EPS)
    return zn * gamma + beta


# ----------------------------------------------------------------------------
# Pallas kernels
# ----------------------------------------------------------------------------

def _posenc_kernel(x_ref, pe_ref, o_ref):
    # Decoder.forward does x = x + (x + pos_enc)  ->  2*x + pos_enc
    o_ref[0] = 2.0 * x_ref[0] + pe_ref[0]


def _attn_block_kernel(xq_ref, xkv_ref, m_ref,
                       wq_ref, bq_ref, wkv_ref, bkv_ref,
                       wo_ref, bo_ref, g_ref, beta_ref,
                       o_ref, *, num_heads, scale):
    """Fused: Q/KV projection + multi-head attention + out-proj + residual + LN.

    Processes one batch element per grid step; all weights, the mask and the
    LayerNorm params are VMEM-resident (constant index_map).
    """
    xq = xq_ref[0]            # (Sq, D) f32 — query source AND residual input
    xkv = xkv_ref[0]          # (Sk, D) f32 — key/value source
    mask = m_ref[0, 0]        # (Sq, Sk)
    D = xq.shape[-1]
    dh = D // num_heads

    # Projections (fused KV weight: (D, 2D)); scale folded into Q once.
    q = (_mm(xq, wq_ref[...]) + bq_ref[...]) * scale        # (Sq, D)
    kv = _mm(xkv, wkv_ref[...]) + bkv_ref[...]               # (Sk, 2D)

    neg_bias = mask * (-1e9)

    # Per-head attention (static unrolled loop, H small): head slicing happens
    # in-kernel on resident tiles — no host-side split/merge transposes.
    ctx_heads = []
    for h in range(num_heads):
        q_h = q[:, h * dh:(h + 1) * dh]                      # (Sq, dh)
        k_h = kv[:, h * dh:(h + 1) * dh]                     # (Sk, dh)
        v_h = kv[:, D + h * dh:D + (h + 1) * dh]             # (Sk, dh)

        # scores = q_h @ k_h.T   (contract last dims, no explicit transpose)
        s = jax.lax.dot_general(
            q_h.astype(MATMUL_DTYPE), k_h.astype(MATMUL_DTYPE),
            (((1,), (1,)), ((), ())),
            preferred_element_type=jnp.float32)              # (Sq, Sk)
        s = s + neg_bias
        s = s - jnp.max(s, axis=-1, keepdims=True)           # stable softmax
        p = jnp.exp(s)
        inv_l = pl.reciprocal(jnp.sum(p, axis=-1, keepdims=True), approx=True)
        p = p * inv_l
        ctx_heads.append(_mm(p, v_h))                        # (Sq, dh)

    ctx = jnp.concatenate(ctx_heads, axis=-1)                # (Sq, D)

    attn = _mm(ctx, wo_ref[...]) + bo_ref[...]               # output projection

    out = _residual_layernorm(xq, attn, g_ref[...], beta_ref[...])
    o_ref[0] = out.astype(o_ref.dtype)


def _ffn_block_kernel(x_ref, w1_ref, b1_ref, w2_ref, b2_ref,
                      g_ref, beta_ref, o_ref):
    """Fused: fc1 + ReLU + fc2 + residual + LayerNorm."""
    x = x_ref[0]                                             # (S, D)
    h = _mm(x, w1_ref[...]) + b1_ref[...]
    h = jnp.maximum(h, 0.0)
    y = _mm(h, w2_ref[...]) + b2_ref[...]
    out = _residual_layernorm(x, y, g_ref[...], beta_ref[...])
    o_ref[0] = out.astype(o_ref.dtype)


# ----------------------------------------------------------------------------
# pallas_call wrappers
# ----------------------------------------------------------------------------

def add_positional(x, pos_enc):
    B, S, D = x.shape
    pe = pos_enc[:, :S, :]                                   # (1, S, D), no broadcast
    return pl.pallas_call(
        _posenc_kernel,
        out_shape=jax.ShapeDtypeStruct((B, S, D), x.dtype),
        grid=(B,),
        in_specs=[
            pl.BlockSpec((1, S, D), lambda b: (b, 0, 0)),
            pl.BlockSpec((1, S, D), lambda b: (0, 0, 0)),    # resident pos-enc
        ],
        out_specs=pl.BlockSpec((1, S, D), lambda b: (b, 0, 0)),
        compiler_params=_COMPILER_PARAMS,
    )(x, pe)


def attention_block(x_q, x_kv, mask, p, ln_g, ln_b, num_heads):
    """Fused attention sub-block: LayerNorm(x_q + MHA(x_q, x_kv, x_kv, mask))."""
    B, Sq, D = x_q.shape
    Sk = x_kv.shape[1]
    dh = D // num_heads
    kernel = functools.partial(_attn_block_kernel, num_heads=num_heads,
                               scale=1.0 / math.sqrt(dh))
    return pl.pallas_call(
        kernel,
        out_shape=jax.ShapeDtypeStruct((B, Sq, D), x_q.dtype),
        grid=(B,),
        in_specs=[
            pl.BlockSpec((1, Sq, D), lambda b: (b, 0, 0)),         # x_q / residual
            pl.BlockSpec((1, Sk, D), lambda b: (b, 0, 0)),         # x_kv
            pl.BlockSpec((1, 1, Sq, Sk), lambda b: (0, 0, 0, 0)),  # mask (resident)
            pl.BlockSpec((D, D), lambda b: (0, 0)),                # wq
            pl.BlockSpec((1, D), lambda b: (0, 0)),                # bq
            pl.BlockSpec((D, 2 * D), lambda b: (0, 0)),            # wkv (fused K|V)
            pl.BlockSpec((1, 2 * D), lambda b: (0, 0)),            # bkv
            pl.BlockSpec((D, D), lambda b: (0, 0)),                # wo
            pl.BlockSpec((1, D), lambda b: (0, 0)),                # bo
            pl.BlockSpec((1, D), lambda b: (0, 0)),                # ln gamma
            pl.BlockSpec((1, D), lambda b: (0, 0)),                # ln beta
        ],
        out_specs=pl.BlockSpec((1, Sq, D), lambda b: (b, 0, 0)),
        compiler_params=_COMPILER_PARAMS,
    )(x_q, x_kv, mask.astype(x_q.dtype),
      p["wq"], p["bq"].reshape(1, D),
      p["wkv"], p["bkv"].reshape(1, 2 * D),
      p["wo"], p["bo"].reshape(1, D),
      ln_g.reshape(1, D), ln_b.reshape(1, D))


def ffn_block(x, p, ln_g, ln_b):
    """Fused FFN sub-block: LayerNorm(x + FFN(x))."""
    B, S, D = x.shape
    d_ff = p["w1"].shape[1]
    return pl.pallas_call(
        _ffn_block_kernel,
        out_shape=jax.ShapeDtypeStruct((B, S, D), x.dtype),
        grid=(B,),
        in_specs=[
            pl.BlockSpec((1, S, D), lambda b: (b, 0, 0)),
            pl.BlockSpec((D, d_ff), lambda b: (0, 0)),             # w1 (resident)
            pl.BlockSpec((1, d_ff), lambda b: (0, 0)),             # b1
            pl.BlockSpec((d_ff, D), lambda b: (0, 0)),             # w2
            pl.BlockSpec((1, D), lambda b: (0, 0)),                # b2
            pl.BlockSpec((1, D), lambda b: (0, 0)),                # ln gamma
            pl.BlockSpec((1, D), lambda b: (0, 0)),                # ln beta
        ],
        out_specs=pl.BlockSpec((1, S, D), lambda b: (b, 0, 0)),
        compiler_params=_COMPILER_PARAMS,
    )(x, p["w1"], p["b1"].reshape(1, d_ff), p["w2"], p["b2"].reshape(1, D),
      ln_g.reshape(1, D), ln_b.reshape(1, D))


# ----------------------------------------------------------------------------
# Decoder (plain-JAX glue orchestrating the 3-calls-per-layer Pallas kernels)
# ----------------------------------------------------------------------------

def decoder_layer(x, enc_output, src_mask, tgt_mask, p, num_heads):
    x = attention_block(x, x, tgt_mask, p["mha1"], p["ln1_g"], p["ln1_b"],
                        num_heads)
    x = attention_block(x, enc_output, src_mask, p["mha2"], p["ln2_g"],
                        p["ln2_b"], num_heads)
    x = ffn_block(x, p["ffn"], p["ln3_g"], p["ln3_b"])
    return x


@functools.partial(jax.jit, static_argnames=("num_heads",))
def decoder_forward(params, x, tgt_mask, enc_output, src_mask, num_heads):
    x = add_positional(x, params["pos_enc"])
    for layer_p in params["layers"]:
        x = decoder_layer(x, enc_output, src_mask, tgt_mask, layer_p, num_heads)
    return x


# ----------------------------------------------------------------------------
# Deterministic parameter init (PyTorch nn.Linear-style uniform bounds)
# ----------------------------------------------------------------------------

def init_linear(key, fan_in, fan_out):
    k1, k2 = jax.random.split(key)
    bound = 1.0 / math.sqrt(fan_in)
    w = jax.random.uniform(k1, (fan_in, fan_out), jnp.float32, -bound, bound)
    b = jax.random.uniform(k2, (fan_out,), jnp.float32, -bound, bound)
    return w, b


def init_mha(key, d_model):
    ks = jax.random.split(key, 4)
    wq, bq = init_linear(ks[0], d_model, d_model)
    wk, bk = init_linear(ks[1], d_model, d_model)
    wv, bv = init_linear(ks[2], d_model, d_model)
    wo, bo = init_linear(ks[3], d_model, d_model)
    # Fuse K and V projections into one (D, 2D) matmul for the kernel.
    return dict(wq=wq, bq=bq,
                wkv=jnp.concatenate([wk, wv], axis=1),
                bkv=jnp.concatenate([bk, bv], axis=0),
                wo=wo, bo=bo)


def init_layer(key, d_model, d_ff):
    ks = jax.random.split(key, 4)
    w1, b1 = init_linear(ks[2], d_model, d_ff)
    w2, b2 = init_linear(ks[3], d_ff, d_model)
    ones = jnp.ones((d_model,), jnp.float32)
    zeros = jnp.zeros((d_model,), jnp.float32)
    return dict(
        mha1=init_mha(ks[0], d_model),
        mha2=init_mha(ks[1], d_model),
        ffn=dict(w1=w1, b1=b1, w2=w2, b2=b2),
        ln1_g=ones, ln1_b=zeros,
        ln2_g=ones, ln2_b=zeros,
        ln3_g=ones, ln3_b=zeros,
    )


def make_positional_encoding(d_model, max_seq_length):
    position = jnp.arange(max_seq_length, dtype=jnp.float32)[:, None]
    div_term = jnp.exp(jnp.arange(0, d_model, 2, dtype=jnp.float32)
                       * (-math.log(10000.0) / d_model))
    pe = jnp.zeros((max_seq_length, d_model), jnp.float32)
    pe = pe.at[:, 0::2].set(jnp.sin(position * div_term))
    pe = pe.at[:, 1::2].set(jnp.cos(position * div_term))
    return pe[None, :, :]                                  # (1, max_seq, d_model)


def init_decoder(key, num_layers, d_model, d_ff, max_seq_length):
    keys = jax.random.split(key, num_layers)
    return dict(
        layers=[init_layer(keys[i], d_model, d_ff) for i in range(num_layers)],
        pos_enc=make_positional_encoding(d_model, max_seq_length),
    )


# ----------------------------------------------------------------------------
if __name__ == "__main__":
    B, S, D, H, D_FF, N_LAYERS, MAX_SEQ = 2, 8, 32, 4, 64, 2, 16

    root = jax.random.PRNGKey(0)
    k_par, k_x, k_enc = jax.random.split(root, 3)

    params = init_decoder(k_par, N_LAYERS, D, D_FF, MAX_SEQ)

    x = jax.random.normal(k_x, (B, S, D), jnp.float32)
    enc_output = jax.random.normal(k_enc, (B, S, D), jnp.float32)

    # causal target mask (1 = masked), zero source mask
    tgt_mask = (jnp.triu(jnp.ones((S, S), jnp.float32), k=1))[None, None, :, :]
    src_mask = jnp.zeros((1, 1, S, S), jnp.float32)

    out = decoder_forward(params, x, tgt_mask, enc_output, src_mask,
                          num_heads=H)
    out = jax.block_until_ready(out)

    assert out.shape == (B, S, D) and out.dtype == jnp.float32
    assert bool(jnp.all(jnp.isfinite(out)))
    print("KERNEL_OK")
</pallas_src>

<mosaic_0001>
module attributes {stable_mosaic.version = 11 : i64} {
  func.func @_posenc_kernel(%arg0: i32, %arg1: memref<1x8x32xf32, #tpu.memory_space<vmem>>, %arg2: memref<1x8x32xf32, #tpu.memory_space<vmem>>, %arg3: memref<1x8x32xf32, #tpu.memory_space<vmem>>) attributes {dimension_semantics = [#tpu.dimension_semantics<parallel>], iteration_bounds = array<i64: 2>, scalar_prefetch = 0 : i64, scratch_operands = 0 : i64, tpu.core_type = #tpu.core_type<tc>, window_params = [{transform_indices = @transform_0, window_bounds = array<i64: 1, 8, 32>}, {pipeline_mode = #tpu.pipeline_mode<synchronous>, transform_indices = @transform_1, window_bounds = array<i64: 1, 8, 32>}, {transform_indices = @transform_2, window_bounds = array<i64: 1, 8, 32>}]} {
    %c0 = arith.constant 0 : index
    %c0_0 = arith.constant 0 : index
    %c0_1 = arith.constant 0 : index
    %0 = vector.load %arg1[%c0, %c0_0, %c0_1] : memref<1x8x32xf32, #tpu.memory_space<vmem>>, vector<1x8x32xf32>
    %1 = vector.shape_cast %0 : vector<1x8x32xf32> to vector<8x32xf32>
    %cst = arith.constant 2.000000e+00 : f32
    %2 = vector.broadcast %cst : f32 to vector<8x32xf32>
    %3 = arith.mulf %2, %1 : vector<8x32xf32>
    %c0_2 = arith.constant 0 : index
    %c0_3 = arith.constant 0 : index
    %c0_4 = arith.constant 0 : index
    %4 = vector.load %arg2[%c0_2, %c0_3, %c0_4] : memref<1x8x32xf32, #tpu.memory_space<vmem>>, vector<1x8x32xf32>
    %5 = vector.shape_cast %4 : vector<1x8x32xf32> to vector<8x32xf32>
    %6 = arith.addf %3, %5 : vector<8x32xf32>
    %c0_5 = arith.constant 0 : index
    %c0_6 = arith.constant 0 : index
    %c0_7 = arith.constant 0 : index
    %7 = vector.load %arg3[%c0_5, %c0_6, %c0_7] : memref<1x8x32xf32, #tpu.memory_space<vmem>>, vector<1x8x32xf32>
    %8 = vector.shape_cast %7 : vector<1x8x32xf32> to vector<8x32xf32>
    %9 = vector.shape_cast %6 : vector<8x32xf32> to vector<1x8x32xf32>
    tpu.vector_store %arg3[%c0_5, %c0_6, %c0_7], %9 {strides = array<i32>} : memref<1x8x32xf32, #tpu.memory_space<vmem>>, vector<1x8x32xf32>,
    return
  }
  func.func @transform_0(%arg0: i32) -> (i32, i32, i32) {
    %c0_i32 = arith.constant 0 : i32
    %c0_i32_0 = arith.constant 0 : i32
    %c0_i32_1 = arith.constant 0 : i32
    return %arg0, %c0_i32, %c0_i32_0 : i32, i32, i32
  }
  func.func @transform_1(%arg0: i32) -> (i32, i32, i32) {
    %c0_i32 = arith.constant 0 : i32
    %c0_i32_0 = arith.constant 0 : i32
    %c0_i32_1 = arith.constant 0 : i32
    %c0_i32_2 = arith.constant 0 : i32
    return %c0_i32, %c0_i32_0, %c0_i32_1 : i32, i32, i32
  }
  func.func @transform_2(%arg0: i32) -> (i32, i32, i32) {
    %c0_i32 = arith.constant 0 : i32
    %c0_i32_0 = arith.constant 0 : i32
    %c0_i32_1 = arith.constant 0 : i32
    return %arg0, %c0_i32, %c0_i32_0 : i32, i32, i32
  }
}

module attributes {stable_mosaic.version = 11 : i64} {
  func.func @_attn_block_kernel(%arg0: i32, %arg1: memref<1x8x32xf32, #tpu.memory_space<vmem>>, %arg2: memref<1x8x32xf32, #tpu.memory_space<vmem>>, %arg3: memref<1x1x8x8xf32, #tpu.memory_space<vmem>>, %arg4: memref<32x32xf32, #tpu.memory_space<vmem>>, %arg5: memref<1x32xf32, #tpu.memory_space<vmem>>, %arg6: memref<32x64xf32, #tpu.memory_space<vmem>>, %arg7: memref<1x64xf32, #tpu.memory_space<vmem>>, %arg8: memref<32x32xf32, #tpu.memory_space<vmem>>, %arg9: memref<1x32xf32, #tpu.memory_space<vmem>>, %arg10: memref<1x32xf32, #tpu.memory_space<vmem>>, %arg11: memref<1x32xf32, #tpu.memory_space<vmem>>, %arg12: memref<1x8x32xf32, #tpu.memory_space<vmem>>) attributes {dimension_semantics = [#tpu.dimension_semantics<parallel>], iteration_bounds = array<i64: 2>, scalar_prefetch = 0 : i64, scratch_operands = 0 : i64, tpu.core_type = #tpu.core_type<tc>, window_params = [{transform_indices = @transform_0, window_bounds = array<i64: 1, 8, 32>}, {transform_indices = @transform_1, window_bounds = array<i64: 1, 8, 32>}, {pipeline_mode = #tpu.pipeline_mode<synchronous>, transform_indices = @transform_2, window_bounds = array<i64: 1, 1, 8, 8>}, {pipeline_mode = #tpu.pipeline_mode<synchronous>, transform_indices = @transform_3, window_bounds = array<i64: 32, 32>}, {pipeline_mode = #tpu.pipeline_mode<synchronous>, transform_indices = @transform_4, window_bounds = array<i64: 1, 32>}, {pipeline_mode = #tpu.pipeline_mode<synchronous>, transform_indices = @transform_5, window_bounds = array<i64: 32, 64>}, {pipeline_mode = #tpu.pipeline_mode<synchronous>, transform_indices = @transform_6, window_bounds = array<i64: 1, 64>}, {pipeline_mode = #tpu.pipeline_mode<synchronous>, transform_indices = @transform_7, window_bounds = array<i64: 32, 32>}, {pipeline_mode = #tpu.pipeline_mode<synchronous>, transform_indices = @transform_8, window_bounds = array<i64: 1, 32>}, {pipeline_mode = #tpu.pipeline_mode<synchronous>, transform_indices = @transform_9, window_bounds = array<i64: 1, 32>}, {pipeline_mode = #tpu.pipeline_mode<synchronous>, transform_indices = @transform_10, window_bounds = array<i64: 1, 32>}, {transform_indices = @transform_11, window_bounds = array<i64: 1, 8, 32>}]} {
    %c0 = arith.constant 0 : index
    %c0_0 = arith.constant 0 : index
    %c0_1 = arith.constant 0 : index
    %0 = vector.load %arg1[%c0, %c0_0, %c0_1] : memref<1x8x32xf32, #tpu.memory_space<vmem>>, vector<1x8x32xf32>
    %1 = vector.shape_cast %0 : vector<1x8x32xf32> to vector<8x32xf32>
    %c0_2 = arith.constant 0 : index
    %c0_3 = arith.constant 0 : index
    %c0_4 = arith.constant 0 : index
    %2 = vector.load %arg2[%c0_2, %c0_3, %c0_4] : memref<1x8x32xf32, #tpu.memory_space<vmem>>, vector<1x8x32xf32>
    %3 = vector.shape_cast %2 : vector<1x8x32xf32> to vector<8x32xf32>
    %c0_5 = arith.constant 0 : index
    %c0_6 = arith.constant 0 : index
    %c0_7 = arith.constant 0 : index
    %c0_8 = arith.constant 0 : index
    %4 = vector.load %arg3[%c0_5, %c0_6, %c0_7, %c0_8] : memref<1x1x8x8xf32, #tpu.memory_space<vmem>>, vector<1x1x8x8xf32>
    %5 = vector.shape_cast %4 : vector<1x1x8x8xf32> to vector<8x8xf32>
    %c0_9 = arith.constant 0 : index
    %c0_10 = arith.constant 0 : index
    %6 = vector.load %arg4[%c0_9, %c0_10] : memref<32x32xf32, #tpu.memory_space<vmem>>, vector<32x32xf32>
    %7 = arith.truncf %1 : vector<8x32xf32> to vector<8x32xbf16>
    %8 = arith.truncf %6 : vector<32x32xf32> to vector<32x32xbf16>
    %cst = arith.constant dense<0.000000e+00> : vector<8x32xf32>
    %9 = tpu.matmul %7, %8, %cst {dimension_numbers = #tpu.dot_dimension_numbers<[1], [0], [0], [1], [0, 0, 1, 1], [], []>} : vector<8x32xbf16>, vector<32x32xbf16>, vector<8x32xf32> -> vector<8x32xf32>
    %c0_11 = arith.constant 0 : index
    %c0_12 = arith.constant 0 : index
    %10 = vector.load %arg5[%c0_11, %c0_12] : memref<1x32xf32, #tpu.memory_space<vmem>>, vector<1x32xf32>
    %11 = vector.broadcast %10 : vector<1x32xf32> to vector<8x32xf32>
    %12 = arith.addf %9, %11 : vector<8x32xf32>
    %cst_13 = arith.constant 0.353553385 : f32
    %13 = vector.broadcast %cst_13 : f32 to vector<8x32xf32>
    %14 = arith.mulf %12, %13 : vector<8x32xf32>
    %c0_14 = arith.constant 0 : index
    %c0_15 = arith.constant 0 : index
    %15 = vector.load %arg6[%c0_14, %c0_15] : memref<32x64xf32, #tpu.memory_space<vmem>>, vector<32x64xf32>
    %16 = arith.truncf %3 : vector<8x32xf32> to vector<8x32xbf16>
    %17 = arith.truncf %15 : vector<32x64xf32> to vector<32x64xbf16>
    %cst_16 = arith.constant dense<0.000000e+00> : vector<8x64xf32>
    %18 = tpu.matmul %16, %17, %cst_16 {dimension_numbers = #tpu.dot_dimension_numbers<[1], [0], [0], [1], [0, 0, 1, 1], [], []>} : vector<8x32xbf16>, vector<32x64xbf16>, vector<8x64xf32> -> vector<8x64xf32>
    %c0_17 = arith.constant 0 : index
    %c0_18 = arith.constant 0 : index
    %19 = vector.load %arg7[%c0_17, %c0_18] : memref<1x64xf32, #tpu.memory_space<vmem>>, vector<1x64xf32>
    %20 = vector.broadcast %19 : vector<1x64xf32> to vector<8x64xf32>
    %21 = arith.addf %18, %20 : vector<8x64xf32>
    %cst_19 = arith.constant -1.000000e+09 : f32
    %22 = vector.broadcast %cst_19 : f32 to vector<8x8xf32>
    %23 = arith.mulf %5, %22 : vector<8x8xf32>
    %24 = vector.extract_strided_slice %14 {offsets = [0, 0], sizes = [8, 8], strides = [1, 1]} : vector<8x32xf32> to vector<8x8xf32>
    %25 = vector.extract_strided_slice %21 {offsets = [0, 0], sizes = [8, 8], strides = [1, 1]} : vector<8x64xf32> to vector<8x8xf32>
    %26 = vector.extract_strided_slice %21 {offsets = [0, 32], sizes = [8, 8], strides = [1, 1]} : vector<8x64xf32> to vector<8x8xf32>
    %27 = arith.truncf %24 : vector<8x8xf32> to vector<8x8xbf16>
    %28 = arith.truncf %25 : vector<8x8xf32> to vector<8x8xbf16>
    %cst_20 = arith.constant dense<0.000000e+00> : vector<8x8xf32>
    %29 = tpu.matmul %27, %28, %cst_20 {dimension_numbers = #tpu.dot_dimension_numbers<[1], [1], [0], [0], [0, 0, 1, 0], [], []>} : vector<8x8xbf16>, vector<8x8xbf16>, vector<8x8xf32> -> vector<8x8xf32>
    %30 = arith.addf %29, %23 : vector<8x8xf32>
    %cst_21 = arith.constant dense<0xFF800000> : vector<8xf32>
    %31 = vector.multi_reduction <maximumf>, %30, %cst_21 [1] : vector<8x8xf32> to vector<8xf32>
    %32 = vector.shape_cast %31 : vector<8xf32> to vector<8x1xf32>
    %33 = vector.broadcast %32 : vector<8x1xf32> to vector<8x8xf32>
    %34 = arith.subf %30, %33 : vector<8x8xf32>
    %35 = math.exp %34 : vector<8x8xf32>
    %cst_22 = arith.constant dense<0.000000e+00> : vector<8xf32>
    %36 = vector.multi_reduction <add>, %35, %cst_22 [1] : vector<8x8xf32> to vector<8xf32>
    %37 = vector.shape_cast %36 : vector<8xf32> to vector<8x1xf32>
    %38 = tpu.reciprocal %37 {approx = true} : vector<8x1xf32> -> vector<8x1xf32>
    %39 = vector.broadcast %38 : vector<8x1xf32> to vector<8x8xf32>
    %40 = arith.mulf %35, %39 : vector<8x8xf32>
    %41 = arith.truncf %40 : vector<8x8xf32> to vector<8x8xbf16>
    %42 = arith.truncf %26 : vector<8x8xf32> to vector<8x8xbf16>
    %cst_23 = arith.constant dense<0.000000e+00> : vector<8x8xf32>
    %43 = tpu.matmul %41, %42, %cst_23 {dimension_numbers = #tpu.dot_dimension_numbers<[1], [0], [0], [1], [0, 0, 1, 1], [], []>} : vector<8x8xbf16>, vector<8x8xbf16>, vector<8x8xf32> -> vector<8x8xf32>
    %44 = vector.extract_strided_slice %14 {offsets = [0, 8], sizes = [8, 8], strides = [1, 1]} : vector<8x32xf32> to vector<8x8xf32>
    %45 = vector.extract_strided_slice %21 {offsets = [0, 8], sizes = [8, 8], strides = [1, 1]} : vector<8x64xf32> to vector<8x8xf32>
    %46 = vector.extract_strided_slice %21 {offsets = [0, 40], sizes = [8, 8], strides = [1, 1]} : vector<8x64xf32> to vector<8x8xf32>
    %47 = arith.truncf %44 : vector<8x8xf32> to vector<8x8xbf16>
    %48 = arith.truncf %45 : vector<8x8xf32> to vector<8x8xbf16>
    %cst_24 = arith.constant dense<0.000000e+00> : vector<8x8xf32>
    %49 = tpu.matmul %47, %48, %cst_24 {dimension_numbers = #tpu.dot_dimension_numbers<[1], [1], [0], [0], [0, 0, 1, 0], [], []>} : vector<8x8xbf16>, vector<8x8xbf16>, vector<8x8xf32> -> vector<8x8xf32>
    %50 = arith.addf %49, %23 : vector<8x8xf32>
    %cst_25 = arith.constant dense<0xFF800000> : vector<8xf32>
    %51 = vector.multi_reduction <maximumf>, %50, %cst_25 [1] : vector<8x8xf32> to vector<8xf32>
    %52 = vector.shape_cast %51 : vector<8xf32> to vector<8x1xf32>
    %53 = vector.broadcast %52 : vector<8x1xf32> to vector<8x8xf32>
    %54 = arith.subf %50, %53 : vector<8x8xf32>
    %55 = math.exp %54 : vector<8x8xf32>
    %cst_26 = arith.constant dense<0.000000e+00> : vector<8xf32>
    %56 = vector.multi_reduction <add>, %55, %cst_26 [1] : vector<8x8xf32> to vector<8xf32>
    %57 = vector.shape_cast %56 : vector<8xf32> to vector<8x1xf32>
    %58 = tpu.reciprocal %57 {approx = true} : vector<8x1xf32> -> vector<8x1xf32>
    %59 = vector.broadcast %58 : vector<8x1xf32> to vector<8x8xf32>
    %60 = arith.mulf %55, %59 : vector<8x8xf32>
    %61 = arith.truncf %60 : vector<8x8xf32> to vector<8x8xbf16>
    %62 = arith.truncf %46 : vector<8x8xf32> to vector<8x8xbf16>
    %cst_27 = arith.constant dense<0.000000e+00> : vector<8x8xf32>
    %63 = tpu.matmul %61, %62, %cst_27 {dimension_numbers = #tpu.dot_dimension_numbers<[1], [0], [0], [1], [0, 0, 1, 1], [], []>} : vector<8x8xbf16>, vector<8x8xbf16>, vector<8x8xf32> -> vector<8x8xf32>
    %64 = vector.extract_strided_slice %14 {offsets = [0, 16], sizes = [8, 8], strides = [1, 1]} : vector<8x32xf32> to vector<8x8xf32>
    %65 = vector.extract_strided_slice %21 {offsets = [0, 16], sizes = [8, 8], strides = [1, 1]} : vector<8x64xf32> to vector<8x8xf32>
    %66 = vector.extract_strided_slice %21 {offsets = [0, 48], sizes = [8, 8], strides = [1, 1]} : vector<8x64xf32> to vector<8x8xf32>
    %67 = arith.truncf %64 : vector<8x8xf32> to vector<8x8xbf16>
    %68 = arith.truncf %65 : vector<8x8xf32> to vector<8x8xbf16>
    %cst_28 = arith.constant dense<0.000000e+00> : vector<8x8xf32>
    %69 = tpu.matmul %67, %68, %cst_28 {dimension_numbers = #tpu.dot_dimension_numbers<[1], [1], [0], [0], [0, 0, 1, 0], [], []>} : vector<8x8xbf16>, vector<8x8xbf16>, vector<8x8xf32> -> vector<8x8xf32>
    %70 = arith.addf %69, %23 : vector<8x8xf32>
    %cst_29 = arith.constant dense<0xFF800000> : vector<8xf32>
    %71 = vector.multi_reduction <maximumf>, %70, %cst_29 [1] : vector<8x8xf32> to vector<8xf32>
    %72 = vector.shape_cast %71 : vector<8xf32> to vector<8x1xf32>
    %73 = vector.broadcast %72 : vector<8x1xf32> to vector<8x8xf32>
    %74 = arith.subf %70, %73 : vector<8x8xf32>
    %75 = math.exp %74 : vector<8x8xf32>
    %cst_30 = arith.constant dense<0.000000e+00> : vector<8xf32>
    %76 = vector.multi_reduction <add>, %75, %cst_30 [1] : vector<8x8xf32> to vector<8xf32>
    %77 = vector.shape_cast %76 : vector<8xf32> to vector<8x1xf32>
    %78 = tpu.reciprocal %77 {approx = true} : vector<8x1xf32> -> vector<8x1xf32>
    %79 = vector.broadcast %78 : vector<8x1xf32> to vector<8x8xf32>
    %80 = arith.mulf %75, %79 : vector<8x8xf32>
    %81 = arith.truncf %80 : vector<8x8xf32> to vector<8x8xbf16>
    %82 = arith.truncf %66 : vector<8x8xf32> to vector<8x8xbf16>
    %cst_31 = arith.constant dense<0.000000e+00> : vector<8x8xf32>
    %83 = tpu.matmul %81, %82, %cst_31 {dimension_numbers = #tpu.dot_dimension_numbers<[1], [0], [0], [1], [0, 0, 1, 1], [], []>} : vector<8x8xbf16>, vector<8x8xbf16>, vector<8x8xf32> -> vector<8x8xf32>
    %84 = vector.extract_strided_slice %14 {offsets = [0, 24], sizes = [8, 8], strides = [1, 1]} : vector<8x32xf32> to vector<8x8xf32>
    %85 = vector.extract_strided_slice %21 {offsets = [0, 24], sizes = [8, 8], strides = [1, 1]} : vector<8x64xf32> to vector<8x8xf32>
    %86 = vector.extract_strided_slice %21 {offsets = [0, 56], sizes = [8, 8], strides = [1, 1]} : vector<8x64xf32> to vector<8x8xf32>
    %87 = arith.truncf %84 : vector<8x8xf32> to vector<8x8xbf16>
    %88 = arith.truncf %85 : vector<8x8xf32> to vector<8x8xbf16>
    %cst_32 = arith.constant dense<0.000000e+00> : vector<8x8xf32>
    %89 = tpu.matmul %87, %88, %cst_32 {dimension_numbers = #tpu.dot_dimension_numbers<[1], [1], [0], [0], [0, 0, 1, 0], [], []>} : vector<8x8xbf16>, vector<8x8xbf16>, vector<8x8xf32> -> vector<8x8xf32>
    %90 = arith.addf %89, %23 : vector<8x8xf32>
    %cst_33 = arith.constant dense<0xFF800000> : vector<8xf32>
    %91 = vector.multi_reduction <maximumf>, %90, %cst_33 [1] : vector<8x8xf32> to vector<8xf32>
    %92 = vector.shape_cast %91 : vector<8xf32> to vector<8x1xf32>
    %93 = vector.broadcast %92 : vector<8x1xf32> to vector<8x8xf32>
    %94 = arith.subf %90, %93 : vector<8x8xf32>
    %95 = math.exp %94 : vector<8x8xf32>
    %cst_34 = arith.constant dense<0.000000e+00> : vector<8xf32>
    %96 = vector.multi_reduction <add>, %95, %cst_34 [1] : vector<8x8xf32> to vector<8xf32>
    %97 = vector.shape_cast %96 : vector<8xf32> to vector<8x1xf32>
    %98 = tpu.reciprocal %97 {approx = true} : vector<8x1xf32> -> vector<8x1xf32>
    %99 = vector.broadcast %98 : vector<8x1xf32> to vector<8x8xf32>
    %100 = arith.mulf %95, %99 : vector<8x8xf32>
    %101 = arith.truncf %100 : vector<8x8xf32> to vector<8x8xbf16>
    %102 = arith.truncf %86 : vector<8x8xf32> to vector<8x8xbf16>
    %cst_35 = arith.constant dense<0.000000e+00> : vector<8x8xf32>
    %103 = tpu.matmul %101, %102, %cst_35 {dimension_numbers = #tpu.dot_dimension_numbers<[1], [0], [0], [1], [0, 0, 1, 1], [], []>} : vector<8x8xbf16>, vector<8x8xbf16>, vector<8x8xf32> -> vector<8x8xf32>
    %104 = tpu.concatenate %43, %63, %83, %103 in 1 : vector<8x8xf32>, vector<8x8xf32>, vector<8x8xf32>, vector<8x8xf32> -> vector<8x32xf32>
    %c0_36 = arith.constant 0 : index
    %c0_37 = arith.constant 0 : index
    %105 = vector.load %arg8[%c0_36, %c0_37] : memref<32x32xf32, #tpu.memory_space<vmem>>, vector<32x32xf32>
    %106 = arith.truncf %104 : vector<8x32xf32> to vector<8x32xbf16>
    %107 = arith.truncf %105 : vector<32x32xf32> to vector<32x32xbf16>
    %cst_38 = arith.constant dense<0.000000e+00> : vector<8x32xf32>
    %108 = tpu.matmul %106, %107, %cst_38 {dimension_numbers = #tpu.dot_dimension_numbers<[1], [0], [0], [1], [0, 0, 1, 1], [], []>} : vector<8x32xbf16>, vector<32x32xbf16>, vector<8x32xf32> -> vector<8x32xf32>
    %c0_39 = arith.constant 0 : index
    %c0_40 = arith.constant 0 : index
    %109 = vector.load %arg9[%c0_39, %c0_40] : memref<1x32xf32, #tpu.memory_space<vmem>>, vector<1x32xf32>
    %110 = vector.broadcast %109 : vector<1x32xf32> to vector<8x32xf32>
    %111 = arith.addf %108, %110 : vector<8x32xf32>
    %c0_41 = arith.constant 0 : index
    %c0_42 = arith.constant 0 : index
    %112 = vector.load %arg10[%c0_41, %c0_42] : memref<1x32xf32, #tpu.memory_space<vmem>>, vector<1x32xf32>
    %c0_43 = arith.constant 0 : index
    %c0_44 = arith.constant 0 : index
    %113 = vector.load %arg11[%c0_43, %c0_44] : memref<1x32xf32, #tpu.memory_space<vmem>>, vector<1x32xf32>
    %114 = arith.addf %1, %111 : vector<8x32xf32>
    %cst_45 = arith.constant dense<0.000000e+00> : vector<8xf32>
    %115 = vector.multi_reduction <add>, %114, %cst_45 [1] : vector<8x32xf32> to vector<8xf32>
    %116 = vector.shape_cast %115 : vector<8xf32> to vector<8x1xf32>
    %cst_46 = arith.constant 3.200000e+01 : f32
    %117 = vector.broadcast %cst_46 : f32 to vector<8x1xf32>
    %118 = arith.divf %116, %117 : vector<8x1xf32>
    %119 = vector.broadcast %118 : vector<8x1xf32> to vector<8x32xf32>
    %120 = arith.subf %114, %119 : vector<8x32xf32>
    %121 = arith.mulf %120, %120 : vector<8x32xf32>
    %cst_47 = arith.constant dense<0.000000e+00> : vector<8xf32>
    %122 = vector.multi_reduction <add>, %121, %cst_47 [1] : vector<8x32xf32> to vector<8xf32>
    %123 = vector.shape_cast %122 : vector<8xf32> to vector<8x1xf32>
    %cst_48 = arith.constant 3.200000e+01 : f32
    %124 = vector.broadcast %cst_48 : f32 to vector<8x1xf32>
    %125 = arith.divf %123, %124 : vector<8x1xf32>
    %126 = vector.broadcast %118 : vector<8x1xf32> to vector<8x32xf32>
    %127 = arith.subf %114, %126 : vector<8x32xf32>
    %cst_49 = arith.constant 9.99999974E-6 : f32
    %128 = vector.broadcast %cst_49 : f32 to vector<8x1xf32>
    %129 = arith.addf %125, %128 : vector<8x1xf32>
    %130 = math.rsqrt %129 : vector<8x1xf32>
    %131 = vector.broadcast %130 : vector<8x1xf32> to vector<8x32xf32>
    %132 = arith.mulf %127, %131 : vector<8x32xf32>
    %133 = vector.broadcast %112 : vector<1x32xf32> to vector<8x32xf32>
    %134 = arith.mulf %132, %133 : vector<8x32xf32>
    %135 = vector.broadcast %113 : vector<1x32xf32> to vector<8x32xf32>
    %136 = arith.addf %134, %135 : vector<8x32xf32>
    %c0_50 = arith.constant 0 : index
    %c0_51 = arith.constant 0 : index
    %c0_52 = arith.constant 0 : index
    %137 = vector.load %arg12[%c0_50, %c0_51, %c0_52] : memref<1x8x32xf32, #tpu.memory_space<vmem>>, vector<1x8x32xf32>
    %138 = vector.shape_cast %137 : vector<1x8x32xf32> to vector<8x32xf32>
    %139 = vector.shape_cast %136 : vector<8x32xf32> to vector<1x8x32xf32>
    tpu.vector_store %arg12[%c0_50, %c0_51, %c0_52], %139 {strides = array<i32>} : memref<1x8x32xf32, #tpu.memory_space<vmem>>, vector<1x8x32xf32>,
    return
  }
  func.func @transform_0(%arg0: i32) -> (i32, i32, i32) {
    %c0_i32 = arith.constant 0 : i32
    %c0_i32_0 = arith.constant 0 : i32
    %c0_i32_1 = arith.constant 0 : i32
    return %arg0, %c0_i32, %c0_i32_0 : i32, i32, i32
  }
  func.func @transform_1(%arg0: i32) -> (i32, i32, i32) {
    %c0_i32 = arith.constant 0 : i32
    %c0_i32_0 = arith.constant 0 : i32
    %c0_i32_1 = arith.constant 0 : i32
    return %arg0, %c0_i32, %c0_i32_0 : i32, i32, i32
  }
  func.func @transform_2(%arg0: i32) -> (i32, i32, i32, i32) {
    %c0_i32 = arith.constant 0 : i32
    %c0_i32_0 = arith.constant 0 : i32
    %c0_i32_1 = arith.constant 0 : i32
    %c0_i32_2 = arith.constant 0 : i32
    %c0_i32_3 = arith.constant 0 : i32
    return %c0_i32, %c0_i32_0, %c0_i32_1, %c0_i32_2 : i32, i32, i32, i32
  }
  func.func @transform_3(%arg0: i32) -> (i32, i32) {
    %c0_i32 = arith.constant 0 : i32
    %c0_i32_0 = arith.constant 0 : i32
    %c0_i32_1 = arith.constant 0 : i32
    return %c0_i32, %c0_i32_0 : i32, i32
  }
  func.func @transform_4(%arg0: i32) -> (i32, i32) {
    %c0_i32 = arith.constant 0 : i32
    %c0_i32_0 = arith.constant 0 : i32
    %c0_i32_1 = arith.constant 0 : i32
    return %c0_i32, %c0_i32_0 : i32, i32
  }
  func.func @transform_5(%arg0: i32) -> (i32, i32) {
    %c0_i32 = arith.constant 0 : i32
    %c0_i32_0 = arith.constant 0 : i32
    %c0_i32_1 = arith.constant 0 : i32
    return %c0_i32, %c0_i32_0 : i32, i32
  }
  func.func @transform_6(%arg0: i32) -> (i32, i32) {
    %c0_i32 = arith.constant 0 : i32
    %c0_i32_0 = arith.constant 0 : i32
    %c0_i32_1 = arith.constant 0 : i32
    return %c0_i32, %c0_i32_0 : i32, i32
  }
  func.func @transform_7(%arg0: i32) -> (i32, i32) {
    %c0_i32 = arith.constant 0 : i32
    %c0_i32_0 = arith.constant 0 : i32
    %c0_i32_1 = arith.constant 0 : i32
    return %c0_i32, %c0_i32_0 : i32, i32
  }
  func.func @transform_8(%arg0: i32) -> (i32, i32) {
    %c0_i32 = arith.constant 0 : i32
    %c0_i32_0 = arith.constant 0 : i32
    %c0_i32_1 = arith.constant 0 : i32
    return %c0_i32, %c0_i32_0 : i32, i32
  }
  func.func @transform_9(%arg0: i32) -> (i32, i32) {
    %c0_i32 = arith.constant 0 : i32
    %c0_i32_0 = arith.constant 0 : i32
    %c0_i32_1 = arith.constant 0 : i32
    return %c0_i32, %c0_i32_0 : i32, i32
  }
  func.func @transform_10(%arg0: i32) -> (i32, i32) {
    %c0_i32 = arith.constant 0 : i32
    %c0_i32_0 = arith.constant 0 : i32
    %c0_i32_1 = arith.constant 0 : i32
    return %c0_i32, %c0_i32_0 : i32, i32
  }
  func.func @transform_11(%arg0: i32) -> (i32, i32, i32) {
    %c0_i32 = arith.constant 0 : i32
    %c0_i32_0 = arith.constant 0 : i32
    %c0_i32_1 = arith.constant 0 : i32
    return %arg0, %c0_i32, %c0_i32_0 : i32, i32, i32
  }
}

module attributes {stable_mosaic.version = 11 : i64} {
  func.func @_attn_block_kernel(%arg0: i32, %arg1: memref<1x8x32xf32, #tpu.memory_space<vmem>>, %arg2: memref<1x8x32xf32, #tpu.memory_space<vmem>>, %arg3: memref<1x1x8x8xf32, #tpu.memory_space<vmem>>, %arg4: memref<32x32xf32, #tpu.memory_space<vmem>>, %arg5: memref<1x32xf32, #tpu.memory_space<vmem>>, %arg6: memref<32x64xf32, #tpu.memory_space<vmem>>, %arg7: memref<1x64xf32, #tpu.memory_space<vmem>>, %arg8: memref<32x32xf32, #tpu.memory_space<vmem>>, %arg9: memref<1x32xf32, #tpu.memory_space<vmem>>, %arg10: memref<1x32xf32, #tpu.memory_space<vmem>>, %arg11: memref<1x32xf32, #tpu.memory_space<vmem>>, %arg12: memref<1x8x32xf32, #tpu.memory_space<vmem>>) attributes {dimension_semantics = [#tpu.dimension_semantics<parallel>], iteration_bounds = array<i64: 2>, scalar_prefetch = 0 : i64, scratch_operands = 0 : i64, tpu.core_type = #tpu.core_type<tc>, window_params = [{transform_indices = @transform_0, window_bounds = array<i64: 1, 8, 32>}, {transform_indices = @transform_1, window_bounds = array<i64: 1, 8, 32>}, {pipeline_mode = #tpu.pipeline_mode<synchronous>, transform_indices = @transform_2, window_bounds = array<i64: 1, 1, 8, 8>}, {pipeline_mode = #tpu.pipeline_mode<synchronous>, transform_indices = @transform_3, window_bounds = array<i64: 32, 32>}, {pipeline_mode = #tpu.pipeline_mode<synchronous>, transform_indices = @transform_4, window_bounds = array<i64: 1, 32>}, {pipeline_mode = #tpu.pipeline_mode<synchronous>, transform_indices = @transform_5, window_bounds = array<i64: 32, 64>}, {pipeline_mode = #tpu.pipeline_mode<synchronous>, transform_indices = @transform_6, window_bounds = array<i64: 1, 64>}, {pipeline_mode = #tpu.pipeline_mode<synchronous>, transform_indices = @transform_7, window_bounds = array<i64: 32, 32>}, {pipeline_mode = #tpu.pipeline_mode<synchronous>, transform_indices = @transform_8, window_bounds = array<i64: 1, 32>}, {pipeline_mode = #tpu.pipeline_mode<synchronous>, transform_indices = @transform_9, window_bounds = array<i64: 1, 32>}, {pipeline_mode = #tpu.pipeline_mode<synchronous>, transform_indices = @transform_10, window_bounds = array<i64: 1, 32>}, {transform_indices = @transform_11, window_bounds = array<i64: 1, 8, 32>}]} {
    %c0 = arith.constant 0 : index
    %c0_0 = arith.constant 0 : index
    %c0_1 = arith.constant 0 : index
    %0 = vector.load %arg1[%c0, %c0_0, %c0_1] : memref<1x8x32xf32, #tpu.memory_space<vmem>>, vector<1x8x32xf32>
    %1 = vector.shape_cast %0 : vector<1x8x32xf32> to vector<8x32xf32>
    %c0_2 = arith.constant 0 : index
    %c0_3 = arith.constant 0 : index
    %c0_4 = arith.constant 0 : index
    %2 = vector.load %arg2[%c0_2, %c0_3, %c0_4] : memref<1x8x32xf32, #tpu.memory_space<vmem>>, vector<1x8x32xf32>
    %3 = vector.shape_cast %2 : vector<1x8x32xf32> to vector<8x32xf32>
    %c0_5 = arith.constant 0 : index
    %c0_6 = arith.constant 0 : index
    %c0_7 = arith.constant 0 : index
    %c0_8 = arith.constant 0 : index
    %4 = vector.load %arg3[%c0_5, %c0_6, %c0_7, %c0_8] : memref<1x1x8x8xf32, #tpu.memory_space<vmem>>, vector<1x1x8x8xf32>
    %5 = vector.shape_cast %4 : vector<1x1x8x8xf32> to vector<8x8xf32>
    %c0_9 = arith.constant 0 : index
    %c0_10 = arith.constant 0 : index
    %6 = vector.load %arg4[%c0_9, %c0_10] : memref<32x32xf32, #tpu.memory_space<vmem>>, vector<32x32xf32>
    %7 = arith.truncf %1 : vector<8x32xf32> to vector<8x32xbf16>
    %8 = arith.truncf %6 : vector<32x32xf32> to vector<32x32xbf16>
    %cst = arith.constant dense<0.000000e+00> : vector<8x32xf32>
    %9 = tpu.matmul %7, %8, %cst {dimension_numbers = #tpu.dot_dimension_numbers<[1], [0], [0], [1], [0, 0, 1, 1], [], []>} : vector<8x32xbf16>, vector<32x32xbf16>, vector<8x32xf32> -> vector<8x32xf32>
    %c0_11 = arith.constant 0 : index
    %c0_12 = arith.constant 0 : index
    %10 = vector.load %arg5[%c0_11, %c0_12] : memref<1x32xf32, #tpu.memory_space<vmem>>, vector<1x32xf32>
    %11 = vector.broadcast %10 : vector<1x32xf32> to vector<8x32xf32>
    %12 = arith.addf %9, %11 : vector<8x32xf32>
    %cst_13 = arith.constant 0.353553385 : f32
    %13 = vector.broadcast %cst_13 : f32 to vector<8x32xf32>
    %14 = arith.mulf %12, %13 : vector<8x32xf32>
    %c0_14 = arith.constant 0 : index
    %c0_15 = arith.constant 0 : index
    %15 = vector.load %arg6[%c0_14, %c0_15] : memref<32x64xf32, #tpu.memory_space<vmem>>, vector<32x64xf32>
    %16 = arith.truncf %3 : vector<8x32xf32> to vector<8x32xbf16>
    %17 = arith.truncf %15 : vector<32x64xf32> to vector<32x64xbf16>
    %cst_16 = arith.constant dense<0.000000e+00> : vector<8x64xf32>
    %18 = tpu.matmul %16, %17, %cst_16 {dimension_numbers = #tpu.dot_dimension_numbers<[1], [0], [0], [1], [0, 0, 1, 1], [], []>} : vector<8x32xbf16>, vector<32x64xbf16>, vector<8x64xf32> -> vector<8x64xf32>
    %c0_17 = arith.constant 0 : index
    %c0_18 = arith.constant 0 : index
    %19 = vector.load %arg7[%c0_17, %c0_18] : memref<1x64xf32, #tpu.memory_space<vmem>>, vector<1x64xf32>
    %20 = vector.broadcast %19 : vector<1x64xf32> to vector<8x64xf32>
    %21 = arith.addf %18, %20 : vector<8x64xf32>
    %cst_19 = arith.constant -1.000000e+09 : f32
    %22 = vector.broadcast %cst_19 : f32 to vector<8x8xf32>
    %23 = arith.mulf %5, %22 : vector<8x8xf32>
    %24 = vector.extract_strided_slice %14 {offsets = [0, 0], sizes = [8, 8], strides = [1, 1]} : vector<8x32xf32> to vector<8x8xf32>
    %25 = vector.extract_strided_slice %21 {offsets = [0, 0], sizes = [8, 8], strides = [1, 1]} : vector<8x64xf32> to vector<8x8xf32>
    %26 = vector.extract_strided_slice %21 {offsets = [0, 32], sizes = [8, 8], strides = [1, 1]} : vector<8x64xf32> to vector<8x8xf32>
    %27 = arith.truncf %24 : vector<8x8xf32> to vector<8x8xbf16>
    %28 = arith.truncf %25 : vector<8x8xf32> to vector<8x8xbf16>
    %cst_20 = arith.constant dense<0.000000e+00> : vector<8x8xf32>
    %29 = tpu.matmul %27, %28, %cst_20 {dimension_numbers = #tpu.dot_dimension_numbers<[1], [1], [0], [0], [0, 0, 1, 0], [], []>} : vector<8x8xbf16>, vector<8x8xbf16>, vector<8x8xf32> -> vector<8x8xf32>
    %30 = arith.addf %29, %23 : vector<8x8xf32>
    %cst_21 = arith.constant dense<0xFF800000> : vector<8xf32>
    %31 = vector.multi_reduction <maximumf>, %30, %cst_21 [1] : vector<8x8xf32> to vector<8xf32>
    %32 = vector.shape_cast %31 : vector<8xf32> to vector<8x1xf32>
    %33 = vector.broadcast %32 : vector<8x1xf32> to vector<8x8xf32>
    %34 = arith.subf %30, %33 : vector<8x8xf32>
    %35 = math.exp %34 : vector<8x8xf32>
    %cst_22 = arith.constant dense<0.000000e+00> : vector<8xf32>
    %36 = vector.multi_reduction <add>, %35, %cst_22 [1] : vector<8x8xf32> to vector<8xf32>
    %37 = vector.shape_cast %36 : vector<8xf32> to vector<8x1xf32>
    %38 = tpu.reciprocal %37 {approx = true} : vector<8x1xf32> -> vector<8x1xf32>
    %39 = vector.broadcast %38 : vector<8x1xf32> to vector<8x8xf32>
    %40 = arith.mulf %35, %39 : vector<8x8xf32>
    %41 = arith.truncf %40 : vector<8x8xf32> to vector<8x8xbf16>
    %42 = arith.truncf %26 : vector<8x8xf32> to vector<8x8xbf16>
    %cst_23 = arith.constant dense<0.000000e+00> : vector<8x8xf32>
    %43 = tpu.matmul %41, %42, %cst_23 {dimension_numbers = #tpu.dot_dimension_numbers<[1], [0], [0], [1], [0, 0, 1, 1], [], []>} : vector<8x8xbf16>, vector<8x8xbf16>, vector<8x8xf32> -> vector<8x8xf32>
    %44 = vector.extract_strided_slice %14 {offsets = [0, 8], sizes = [8, 8], strides = [1, 1]} : vector<8x32xf32> to vector<8x8xf32>
    %45 = vector.extract_strided_slice %21 {offsets = [0, 8], sizes = [8, 8], strides = [1, 1]} : vector<8x64xf32> to vector<8x8xf32>
    %46 = vector.extract_strided_slice %21 {offsets = [0, 40], sizes = [8, 8], strides = [1, 1]} : vector<8x64xf32> to vector<8x8xf32>
    %47 = arith.truncf %44 : vector<8x8xf32> to vector<8x8xbf16>
    %48 = arith.truncf %45 : vector<8x8xf32> to vector<8x8xbf16>
    %cst_24 = arith.constant dense<0.000000e+00> : vector<8x8xf32>
    %49 = tpu.matmul %47, %48, %cst_24 {dimension_numbers = #tpu.dot_dimension_numbers<[1], [1], [0], [0], [0, 0, 1, 0], [], []>} : vector<8x8xbf16>, vector<8x8xbf16>, vector<8x8xf32> -> vector<8x8xf32>
    %50 = arith.addf %49, %23 : vector<8x8xf32>
    %cst_25 = arith.constant dense<0xFF800000> : vector<8xf32>
    %51 = vector.multi_reduction <maximumf>, %50, %cst_25 [1] : vector<8x8xf32> to vector<8xf32>
    %52 = vector.shape_cast %51 : vector<8xf32> to vector<8x1xf32>
    %53 = vector.broadcast %52 : vector<8x1xf32> to vector<8x8xf32>
    %54 = arith.subf %50, %53 : vector<8x8xf32>
    %55 = math.exp %54 : vector<8x8xf32>
    %cst_26 = arith.constant dense<0.000000e+00> : vector<8xf32>
    %56 = vector.multi_reduction <add>, %55, %cst_26 [1] : vector<8x8xf32> to vector<8xf32>
    %57 = vector.shape_cast %56 : vector<8xf32> to vector<8x1xf32>
    %58 = tpu.reciprocal %57 {approx = true} : vector<8x1xf32> -> vector<8x1xf32>
    %59 = vector.broadcast %58 : vector<8x1xf32> to vector<8x8xf32>
    %60 = arith.mulf %55, %59 : vector<8x8xf32>
    %61 = arith.truncf %60 : vector<8x8xf32> to vector<8x8xbf16>
    %62 = arith.truncf %46 : vector<8x8xf32> to vector<8x8xbf16>
    %cst_27 = arith.constant dense<0.000000e+00> : vector<8x8xf32>
    %63 = tpu.matmul %61, %62, %cst_27 {dimension_numbers = #tpu.dot_dimension_numbers<[1], [0], [0], [1], [0, 0, 1, 1], [], []>} : vector<8x8xbf16>, vector<8x8xbf16>, vector<8x8xf32> -> vector<8x8xf32>
    %64 = vector.extract_strided_slice %14 {offsets = [0, 16], sizes = [8, 8], strides = [1, 1]} : vector<8x32xf32> to vector<8x8xf32>
    %65 = vector.extract_strided_slice %21 {offsets = [0, 16], sizes = [8, 8], strides = [1, 1]} : vector<8x64xf32> to vector<8x8xf32>
    %66 = vector.extract_strided_slice %21 {offsets = [0, 48], sizes = [8, 8], strides = [1, 1]} : vector<8x64xf32> to vector<8x8xf32>
    %67 = arith.truncf %64 : vector<8x8xf32> to vector<8x8xbf16>
    %68 = arith.truncf %65 : vector<8x8xf32> to vector<8x8xbf16>
    %cst_28 = arith.constant dense<0.000000e+00> : vector<8x8xf32>
    %69 = tpu.matmul %67, %68, %cst_28 {dimension_numbers = #tpu.dot_dimension_numbers<[1], [1], [0], [0], [0, 0, 1, 0], [], []>} : vector<8x8xbf16>, vector<8x8xbf16>, vector<8x8xf32> -> vector<8x8xf32>
    %70 = arith.addf %69, %23 : vector<8x8xf32>
    %cst_29 = arith.constant dense<0xFF800000> : vector<8xf32>
    %71 = vector.multi_reduction <maximumf>, %70, %cst_29 [1] : vector<8x8xf32> to vector<8xf32>
    %72 = vector.shape_cast %71 : vector<8xf32> to vector<8x1xf32>
    %73 = vector.broadcast %72 : vector<8x1xf32> to vector<8x8xf32>
    %74 = arith.subf %70, %73 : vector<8x8xf32>
    %75 = math.exp %74 : vector<8x8xf32>
    %cst_30 = arith.constant dense<0.000000e+00> : vector<8xf32>
    %76 = vector.multi_reduction <add>, %75, %cst_30 [1] : vector<8x8xf32> to vector<8xf32>
    %77 = vector.shape_cast %76 : vector<8xf32> to vector<8x1xf32>
    %78 = tpu.reciprocal %77 {approx = true} : vector<8x1xf32> -> vector<8x1xf32>
    %79 = vector.broadcast %78 : vector<8x1xf32> to vector<8x8xf32>
    %80 = arith.mulf %75, %79 : vector<8x8xf32>
    %81 = arith.truncf %80 : vector<8x8xf32> to vector<8x8xbf16>
    %82 = arith.truncf %66 : vector<8x8xf32> to vector<8x8xbf16>
    %cst_31 = arith.constant dense<0.000000e+00> : vector<8x8xf32>
    %83 = tpu.matmul %81, %82, %cst_31 {dimension_numbers = #tpu.dot_dimension_numbers<[1], [0], [0], [1], [0, 0, 1, 1], [], []>} : vector<8x8xbf16>, vector<8x8xbf16>, vector<8x8xf32> -> vector<8x8xf32>
    %84 = vector.extract_strided_slice %14 {offsets = [0, 24], sizes = [8, 8], strides = [1, 1]} : vector<8x32xf32> to vector<8x8xf32>
    %85 = vector.extract_strided_slice %21 {offsets = [0, 24], sizes = [8, 8], strides = [1, 1]} : vector<8x64xf32> to vector<8x8xf32>
    %86 = vector.extract_strided_slice %21 {offsets = [0, 56], sizes = [8, 8], strides = [1, 1]} : vector<8x64xf32> to vector<8x8xf32>
    %87 = arith.truncf %84 : vector<8x8xf32> to vector<8x8xbf16>
    %88 = arith.truncf %85 : vector<8x8xf32> to vector<8x8xbf16>
    %cst_32 = arith.constant dense<0.000000e+00> : vector<8x8xf32>
    %89 = tpu.matmul %87, %88, %cst_32 {dimension_numbers = #tpu.dot_dimension_numbers<[1], [1], [0], [0], [0, 0, 1, 0], [], []>} : vector<8x8xbf16>, vector<8x8xbf16>, vector<8x8xf32> -> vector<8x8xf32>
    %90 = arith.addf %89, %23 : vector<8x8xf32>
    %cst_33 = arith.constant dense<0xFF800000> : vector<8xf32>
    %91 = vector.multi_reduction <maximumf>, %90, %cst_33 [1] : vector<8x8xf32> to vector<8xf32>
    %92 = vector.shape_cast %91 : vector<8xf32> to vector<8x1xf32>
    %93 = vector.broadcast %92 : vector<8x1xf32> to vector<8x8xf32>
    %94 = arith.subf %90, %93 : vector<8x8xf32>
    %95 = math.exp %94 : vector<8x8xf32>
    %cst_34 = arith.constant dense<0.000000e+00> : vector<8xf32>
    %96 = vector.multi_reduction <add>, %95, %cst_34 [1] : vector<8x8xf32> to vector<8xf32>
    %97 = vector.shape_cast %96 : vector<8xf32> to vector<8x1xf32>
    %98 = tpu.reciprocal %97 {approx = true} : vector<8x1xf32> -> vector<8x1xf32>
    %99 = vector.broadcast %98 : vector<8x1xf32> to vector<8x8xf32>
    %100 = arith.mulf %95, %99 : vector<8x8xf32>
    %101 = arith.truncf %100 : vector<8x8xf32> to vector<8x8xbf16>
    %102 = arith.truncf %86 : vector<8x8xf32> to vector<8x8xbf16>
    %cst_35 = arith.constant dense<0.000000e+00> : vector<8x8xf32>
    %103 = tpu.matmul %101, %102, %cst_35 {dimension_numbers = #tpu.dot_dimension_numbers<[1], [0], [0], [1], [0, 0, 1, 1], [], []>} : vector<8x8xbf16>, vector<8x8xbf16>, vector<8x8xf32> -> vector<8x8xf32>
    %104 = tpu.concatenate %43, %63, %83, %103 in 1 : vector<8x8xf32>, vector<8x8xf32>, vector<8x8xf32>, vector<8x8xf32> -> vector<8x32xf32>
    %c0_36 = arith.constant 0 : index
    %c0_37 = arith.constant 0 : index
    %105 = vector.load %arg8[%c0_36, %c0_37] : memref<32x32xf32, #tpu.memory_space<vmem>>, vector<32x32xf32>
    %106 = arith.truncf %104 : vector<8x32xf32> to vector<8x32xbf16>
    %107 = arith.truncf %105 : vector<32x32xf32> to vector<32x32xbf16>
    %cst_38 = arith.constant dense<0.000000e+00> : vector<8x32xf32>
    %108 = tpu.matmul %106, %107, %cst_38 {dimension_numbers = #tpu.dot_dimension_numbers<[1], [0], [0], [1], [0, 0, 1, 1], [], []>} : vector<8x32xbf16>, vector<32x32xbf16>, vector<8x32xf32> -> vector<8x32xf32>
    %c0_39 = arith.constant 0 : index
    %c0_40 = arith.constant 0 : index
    %109 = vector.load %arg9[%c0_39, %c0_40] : memref<1x32xf32, #tpu.memory_space<vmem>>, vector<1x32xf32>
    %110 = vector.broadcast %109 : vector<1x32xf32> to vector<8x32xf32>
    %111 = arith.addf %108, %110 : vector<8x32xf32>
    %c0_41 = arith.constant 0 : index
    %c0_42 = arith.constant 0 : index
    %112 = vector.load %arg10[%c0_41, %c0_42] : memref<1x32xf32, #tpu.memory_space<vmem>>, vector<1x32xf32>
    %c0_43 = arith.constant 0 : index
    %c0_44 = arith.constant 0 : index
    %113 = vector.load %arg11[%c0_43, %c0_44] : memref<1x32xf32, #tpu.memory_space<vmem>>, vector<1x32xf32>
    %114 = arith.addf %1, %111 : vector<8x32xf32>
    %cst_45 = arith.constant dense<0.000000e+00> : vector<8xf32>
    %115 = vector.multi_reduction <add>, %114, %cst_45 [1] : vector<8x32xf32> to vector<8xf32>
    %116 = vector.shape_cast %115 : vector<8xf32> to vector<8x1xf32>
    %cst_46 = arith.constant 3.200000e+01 : f32
    %117 = vector.broadcast %cst_46 : f32 to vector<8x1xf32>
    %118 = arith.divf %116, %117 : vector<8x1xf32>
    %119 = vector.broadcast %118 : vector<8x1xf32> to vector<8x32xf32>
    %120 = arith.subf %114, %119 : vector<8x32xf32>
    %121 = arith.mulf %120, %120 : vector<8x32xf32>
    %cst_47 = arith.constant dense<0.000000e+00> : vector<8xf32>
    %122 = vector.multi_reduction <add>, %121, %cst_47 [1] : vector<8x32xf32> to vector<8xf32>
    %123 = vector.shape_cast %122 : vector<8xf32> to vector<8x1xf32>
    %cst_48 = arith.constant 3.200000e+01 : f32
    %124 = vector.broadcast %cst_48 : f32 to vector<8x1xf32>
    %125 = arith.divf %123, %124 : vector<8x1xf32>
    %126 = vector.broadcast %118 : vector<8x1xf32> to vector<8x32xf32>
    %127 = arith.subf %114, %126 : vector<8x32xf32>
    %cst_49 = arith.constant 9.99999974E-6 : f32
    %128 = vector.broadcast %cst_49 : f32 to vector<8x1xf32>
    %129 = arith.addf %125, %128 : vector<8x1xf32>
    %130 = math.rsqrt %129 : vector<8x1xf32>
    %131 = vector.broadcast %130 : vector<8x1xf32> to vector<8x32xf32>
    %132 = arith.mulf %127, %131 : vector<8x32xf32>
    %133 = vector.broadcast %112 : vector<1x32xf32> to vector<8x32xf32>
    %134 = arith.mulf %132, %133 : vector<8x32xf32>
    %135 = vector.broadcast %113 : vector<1x32xf32> to vector<8x32xf32>
    %136 = arith.addf %134, %135 : vector<8x32xf32>
    %c0_50 = arith.constant 0 : index
    %c0_51 = arith.constant 0 : index
    %c0_52 = arith.constant 0 : index
    %137 = vector.load %arg12[%c0_50, %c0_51, %c0_52] : memref<1x8x32xf32, #tpu.memory_space<vmem>>, vector<1x8x32xf32>
    %138 = vector.shape_cast %137 : vector<1x8x32xf32> to vector<8x32xf32>
    %139 = vector.shape_cast %136 : vector<8x32xf32> to vector<1x8x32xf32>
    tpu.vector_store %arg12[%c0_50, %c0_51, %c0_52], %139 {strides = array<i32>} : memref<1x8x32xf32, #tpu.memory_space<vmem>>, vector<1x8x32xf32>,
    return
  }
  func.func @transform_0(%arg0: i32) -> (i32, i32, i32) {
    %c0_i32 = arith.constant 0 : i32
    %c0_i32_0 = arith.constant 0 : i32
    %c0_i32_1 = arith.constant 0 : i32
    return %arg0, %c0_i32, %c0_i32_0 : i32, i32, i32
  }
  func.func @transform_1(%arg0: i32) -> (i32, i32, i32) {
    %c0_i32 = arith.constant 0 : i32
    %c0_i32_0 = arith.constant 0 : i32
    %c0_i32_1 = arith.constant 0 : i32
    return %arg0, %c0_i32, %c0_i32_0 : i32, i32, i32
  }
  func.func @transform_2(%arg0: i32) -> (i32, i32, i32, i32) {
    %c0_i32 = arith.constant 0 : i32
    %c0_i32_0 = arith.constant 0 : i32
    %c0_i32_1 = arith.constant 0 : i32
    %c0_i32_2 = arith.constant 0 : i32
    %c0_i32_3 = arith.constant 0 : i32
    return %c0_i32, %c0_i32_0, %c0_i32_1, %c0_i32_2 : i32, i32, i32, i32
  }
  func.func @transform_3(%arg0: i32) -> (i32, i32) {
    %c0_i32 = arith.constant 0 : i32
    %c0_i32_0 = arith.constant 0 : i32
    %c0_i32_1 = arith.constant 0 : i32
    return %c0_i32, %c0_i32_0 : i32, i32
  }
  func.func @transform_4(%arg0: i32) -> (i32, i32) {
    %c0_i32 = arith.constant 0 : i32
    %c0_i32_0 = arith.constant 0 : i32
    %c0_i32_1 = arith.constant 0 : i32
    return %c0_i32, %c0_i32_0 : i32, i32
  }
  func.func @transform_5(%arg0: i32) -> (i32, i32) {
    %c0_i32 = arith.constant 0 : i32
    %c0_i32_0 = arith.constant 0 : i32
    %c0_i32_1 = arith.constant 0 : i32
    return %c0_i32, %c0_i32_0 : i32, i32
  }
  func.func @transform_6(%arg0: i32) -> (i32, i32) {
    %c0_i32 = arith.constant 0 : i32
    %c0_i32_0 = arith.constant 0 : i32
    %c0_i32_1 = arith.constant 0 : i32
    return %c0_i32, %c0_i32_0 : i32, i32
  }
  func.func @transform_7(%arg0: i32) -> (i32, i32) {
    %c0_i32 = arith.constant 0 : i32
    %c0_i32_0 = arith.constant 0 : i32
    %c0_i32_1 = arith.constant 0 : i32
    return %c0_i32, %c0_i32_0 : i32, i32
  }
  func.func @transform_8(%arg0: i32) -> (i32, i32) {
    %c0_i32 = arith.constant 0 : i32
    %c0_i32_0 = arith.constant 0 : i32
    %c0_i32_1 = arith.constant 0 : i32
    return %c0_i32, %c0_i32_0 : i32, i32
  }
  func.func @transform_9(%arg0: i32) -> (i32, i32) {
    %c0_i32 = arith.constant 0 : i32
    %c0_i32_0 = arith.constant 0 : i32
    %c0_i32_1 = arith.constant 0 : i32
    return %c0_i32, %c0_i32_0 : i32, i32
  }
  func.func @transform_10(%arg0: i32) -> (i32, i32) {
    %c0_i32 = arith.constant 0 : i32
    %c0_i32_0 = arith.constant 0 : i32
    %c0_i32_1 = arith.constant 0 : i32
    return %c0_i32, %c0_i32_0 : i32, i32
  }
  func.func @transform_11(%arg0: i32) -> (i32, i32, i32) {
    %c0_i32 = arith.constant 0 : i32
    %c0_i32_0 = arith.constant 0 : i32
    %c0_i32_1 = arith.constant 0 : i32
    return %arg0, %c0_i32, %c0_i32_0 : i32, i32, i32
  }
}

module attributes {stable_mosaic.version = 11 : i64} {
  func.func @_ffn_block_kernel(%arg0: i32, %arg1: memref<1x8x32xf32, #tpu.memory_space<vmem>>, %arg2: memref<32x64xf32, #tpu.memory_space<vmem>>, %arg3: memref<1x64xf32, #tpu.memory_space<vmem>>, %arg4: memref<64x32xf32, #tpu.memory_space<vmem>>, %arg5: memref<1x32xf32, #tpu.memory_space<vmem>>, %arg6: memref<1x32xf32, #tpu.memory_space<vmem>>, %arg7: memref<1x32xf32, #tpu.memory_space<vmem>>, %arg8: memref<1x8x32xf32, #tpu.memory_space<vmem>>) attributes {dimension_semantics = [#tpu.dimension_semantics<parallel>], iteration_bounds = array<i64: 2>, scalar_prefetch = 0 : i64, scratch_operands = 0 : i64, tpu.core_type = #tpu.core_type<tc>, window_params = [{transform_indices = @transform_0, window_bounds = array<i64: 1, 8, 32>}, {pipeline_mode = #tpu.pipeline_mode<synchronous>, transform_indices = @transform_1, window_bounds = array<i64: 32, 64>}, {pipeline_mode = #tpu.pipeline_mode<synchronous>, transform_indices = @transform_2, window_bounds = array<i64: 1, 64>}, {pipeline_mode = #tpu.pipeline_mode<synchronous>, transform_indices = @transform_3, window_bounds = array<i64: 64, 32>}, {pipeline_mode = #tpu.pipeline_mode<synchronous>, transform_indices = @transform_4, window_bounds = array<i64: 1, 32>}, {pipeline_mode = #tpu.pipeline_mode<synchronous>, transform_indices = @transform_5, window_bounds = array<i64: 1, 32>}, {pipeline_mode = #tpu.pipeline_mode<synchronous>, transform_indices = @transform_6, window_bounds = array<i64: 1, 32>}, {transform_indices = @transform_7, window_bounds = array<i64: 1, 8, 32>}]} {
    %c0 = arith.constant 0 : index
    %c0_0 = arith.constant 0 : index
    %c0_1 = arith.constant 0 : index
    %0 = vector.load %arg1[%c0, %c0_0, %c0_1] : memref<1x8x32xf32, #tpu.memory_space<vmem>>, vector<1x8x32xf32>
    %1 = vector.shape_cast %0 : vector<1x8x32xf32> to vector<8x32xf32>
    %c0_2 = arith.constant 0 : index
    %c0_3 = arith.constant 0 : index
    %2 = vector.load %arg2[%c0_2, %c0_3] : memref<32x64xf32, #tpu.memory_space<vmem>>, vector<32x64xf32>
    %3 = arith.truncf %1 : vector<8x32xf32> to vector<8x32xbf16>
    %4 = arith.truncf %2 : vector<32x64xf32> to vector<32x64xbf16>
    %cst = arith.constant dense<0.000000e+00> : vector<8x64xf32>
    %5 = tpu.matmul %3, %4, %cst {dimension_numbers = #tpu.dot_dimension_numbers<[1], [0], [0], [1], [0, 0, 1, 1], [], []>} : vector<8x32xbf16>, vector<32x64xbf16>, vector<8x64xf32> -> vector<8x64xf32>
    %c0_4 = arith.constant 0 : index
    %c0_5 = arith.constant 0 : index
    %6 = vector.load %arg3[%c0_4, %c0_5] : memref<1x64xf32, #tpu.memory_space<vmem>>, vector<1x64xf32>
    %7 = vector.broadcast %6 : vector<1x64xf32> to vector<8x64xf32>
    %8 = arith.addf %5, %7 : vector<8x64xf32>
    %cst_6 = arith.constant 0.000000e+00 : f32
    %9 = vector.broadcast %cst_6 : f32 to vector<8x64xf32>
    %10 = arith.maximumf %8, %9 : vector<8x64xf32>
    %c0_7 = arith.constant 0 : index
    %c0_8 = arith.constant 0 : index
    %11 = vector.load %arg4[%c0_7, %c0_8] : memref<64x32xf32, #tpu.memory_space<vmem>>, vector<64x32xf32>
    %12 = arith.truncf %10 : vector<8x64xf32> to vector<8x64xbf16>
    %13 = arith.truncf %11 : vector<64x32xf32> to vector<64x32xbf16>
    %cst_9 = arith.constant dense<0.000000e+00> : vector<8x32xf32>
    %14 = tpu.matmul %12, %13, %cst_9 {dimension_numbers = #tpu.dot_dimension_numbers<[1], [0], [0], [1], [0, 0, 1, 1], [], []>} : vector<8x64xbf16>, vector<64x32xbf16>, vector<8x32xf32> -> vector<8x32xf32>
    %c0_10 = arith.constant 0 : index
    %c0_11 = arith.constant 0 : index
    %15 = vector.load %arg5[%c0_10, %c0_11] : memref<1x32xf32, #tpu.memory_space<vmem>>, vector<1x32xf32>
    %16 = vector.broadcast %15 : vector<1x32xf32> to vector<8x32xf32>
    %17 = arith.addf %14, %16 : vector<8x32xf32>
    %c0_12 = arith.constant 0 : index
    %c0_13 = arith.constant 0 : index
    %18 = vector.load %arg6[%c0_12, %c0_13] : memref<1x32xf32, #tpu.memory_space<vmem>>, vector<1x32xf32>
    %c0_14 = arith.constant 0 : index
    %c0_15 = arith.constant 0 : index
    %19 = vector.load %arg7[%c0_14, %c0_15] : memref<1x32xf32, #tpu.memory_space<vmem>>, vector<1x32xf32>
    %20 = arith.addf %1, %17 : vector<8x32xf32>
    %cst_16 = arith.constant dense<0.000000e+00> : vector<8xf32>
    %21 = vector.multi_reduction <add>, %20, %cst_16 [1] : vector<8x32xf32> to vector<8xf32>
    %22 = vector.shape_cast %21 : vector<8xf32> to vector<8x1xf32>
    %cst_17 = arith.constant 3.200000e+01 : f32
    %23 = vector.broadcast %cst_17 : f32 to vector<8x1xf32>
    %24 = arith.divf %22, %23 : vector<8x1xf32>
    %25 = vector.broadcast %24 : vector<8x1xf32> to vector<8x32xf32>
    %26 = arith.subf %20, %25 : vector<8x32xf32>
    %27 = arith.mulf %26, %26 : vector<8x32xf32>
    %cst_18 = arith.constant dense<0.000000e+00> : vector<8xf32>
    %28 = vector.multi_reduction <add>, %27, %cst_18 [1] : vector<8x32xf32> to vector<8xf32>
    %29 = vector.shape_cast %28 : vector<8xf32> to vector<8x1xf32>
    %cst_19 = arith.constant 3.200000e+01 : f32
    %30 = vector.broadcast %cst_19 : f32 to vector<8x1xf32>
    %31 = arith.divf %29, %30 : vector<8x1xf32>
    %32 = vector.broadcast %24 : vector<8x1xf32> to vector<8x32xf32>
    %33 = arith.subf %20, %32 : vector<8x32xf32>
    %cst_20 = arith.constant 9.99999974E-6 : f32
    %34 = vector.broadcast %cst_20 : f32 to vector<8x1xf32>
    %35 = arith.addf %31, %34 : vector<8x1xf32>
    %36 = math.rsqrt %35 : vector<8x1xf32>
    %37 = vector.broadcast %36 : vector<8x1xf32> to vector<8x32xf32>
    %38 = arith.mulf %33, %37 : vector<8x32xf32>
    %39 = vector.broadcast %18 : vector<1x32xf32> to vector<8x32xf32>
    %40 = arith.mulf %38, %39 : vector<8x32xf32>
    %41 = vector.broadcast %19 : vector<1x32xf32> to vector<8x32xf32>
    %42 = arith.addf %40, %41 : vector<8x32xf32>
    %c0_21 = arith.constant 0 : index
    %c0_22 = arith.constant 0 : index
    %c0_23 = arith.constant 0 : index
    %43 = vector.load %arg8[%c0_21, %c0_22, %c0_23] : memref<1x8x32xf32, #tpu.memory_space<vmem>>, vector<1x8x32xf32>
    %44 = vector.shape_cast %43 : vector<1x8x32xf32> to vector<8x32xf32>
    %45 = vector.shape_cast %42 : vector<8x32xf32> to vector<1x8x32xf32>
    tpu.vector_store %arg8[%c0_21, %c0_22, %c0_23], %45 {strides = array<i32>} : memref<1x8x32xf32, #tpu.memory_space<vmem>>, vector<1x8x32xf32>,
    return
  }
  func.func @transform_0(%arg0: i32) -> (i32, i32, i32) {
    %c0_i32 = arith.constant 0 : i32
    %c0_i32_0 = arith.constant 0 : i32
    %c0_i32_1 = arith.constant 0 : i32
    return %arg0, %c0_i32, %c0_i32_0 : i32, i32, i32
  }
  func.func @transform_1(%arg0: i32) -> (i32, i32) {
    %c0_i32 = arith.constant 0 : i32
    %c0_i32_0 = arith.constant 0 : i32
    %c0_i32_1 = arith.constant 0 : i32
    return %c0_i32, %c0_i32_0 : i32, i32
  }
  func.func @transform_2(%arg0: i32) -> (i32, i32) {
    %c0_i32 = arith.constant 0 : i32
    %c0_i32_0 = arith.constant 0 : i32
    %c0_i32_1 = arith.constant 0 : i32
    return %c0_i32, %c0_i32_0 : i32, i32
  }
  func.func @transform_3(%arg0: i32) -> (i32, i32) {
    %c0_i32 = arith.constant 0 : i32
    %c0_i32_0 = arith.constant 0 : i32
    %c0_i32_1 = arith.constant 0 : i32
    return %c0_i32, %c0_i32_0 : i32, i32
  }
  func.func @transform_4(%arg0: i32) -> (i32, i32) {
    %c0_i32 = arith.constant 0 : i32
    %c0_i32_0 = arith.constant 0 : i32
    %c0_i32_1 = arith.constant 0 : i32
    return %c0_i32, %c0_i32_0 : i32, i32
  }
  func.func @transform_5(%arg0: i32) -> (i32, i32) {
    %c0_i32 = arith.constant 0 : i32
    %c0_i32_0 = arith.constant 0 : i32
    %c0_i32_1 = arith.constant 0 : i32
    return %c0_i32, %c0_i32_0 : i32, i32
  }
  func.func @transform_6(%arg0: i32) -> (i32, i32) {
    %c0_i32 = arith.constant 0 : i32
    %c0_i32_0 = arith.constant 0 : i32
    %c0_i32_1 = arith.constant 0 : i32
    return %c0_i32, %c0_i32_0 : i32, i32
  }
  func.func @transform_7(%arg0: i32) -> (i32, i32, i32) {
    %c0_i32 = arith.constant 0 : i32
    %c0_i32_0 = arith.constant 0 : i32
    %c0_i32_1 = arith.constant 0 : i32
    return %arg0, %c0_i32, %c0_i32_0 : i32, i32, i32
  }
}

module attributes {stable_mosaic.version = 11 : i64} {
  func.func @_ffn_block_kernel(%arg0: i32, %arg1: memref<1x8x32xf32, #tpu.memory_space<vmem>>, %arg2: memref<32x64xf32, #tpu.memory_space<vmem>>, %arg3: memref<1x64xf32, #tpu.memory_space<vmem>>, %arg4: memref<64x32xf32, #tpu.memory_space<vmem>>, %arg5: memref<1x32xf32, #tpu.memory_space<vmem>>, %arg6: memref<1x32xf32, #tpu.memory_space<vmem>>, %arg7: memref<1x32xf32, #tpu.memory_space<vmem>>, %arg8: memref<1x8x32xf32, #tpu.memory_space<vmem>>) attributes {dimension_semantics = [#tpu.dimension_semantics<parallel>], iteration_bounds = array<i64: 2>, scalar_prefetch = 0 : i64, scratch_operands = 0 : i64, tpu.core_type = #tpu.core_type<tc>, window_params = [{transform_indices = @transform_0, window_bounds = array<i64: 1, 8, 32>}, {pipeline_mode = #tpu.pipeline_mode<synchronous>, transform_indices = @transform_1, window_bounds = array<i64: 32, 64>}, {pipeline_mode = #tpu.pipeline_mode<synchronous>, transform_indices = @transform_2, window_bounds = array<i64: 1, 64>}, {pipeline_mode = #tpu.pipeline_mode<synchronous>, transform_indices = @transform_3, window_bounds = array<i64: 64, 32>}, {pipeline_mode = #tpu.pipeline_mode<synchronous>, transform_indices = @transform_4, window_bounds = array<i64: 1, 32>}, {pipeline_mode = #tpu.pipeline_mode<synchronous>, transform_indices = @transform_5, window_bounds = array<i64: 1, 32>}, {pipeline_mode = #tpu.pipeline_mode<synchronous>, transform_indices = @transform_6, window_bounds = array<i64: 1, 32>}, {transform_indices = @transform_7, window_bounds = array<i64: 1, 8, 32>}]} {
    %c0 = arith.constant 0 : index
    %c0_0 = arith.constant 0 : index
    %c0_1 = arith.constant 0 : index
    %0 = vector.load %arg1[%c0, %c0_0, %c0_1] : memref<1x8x32xf32, #tpu.memory_space<vmem>>, vector<1x8x32xf32>
    %1 = vector.shape_cast %0 : vector<1x8x32xf32> to vector<8x32xf32>
    %c0_2 = arith.constant 0 : index
    %c0_3 = arith.constant 0 : index
    %2 = vector.load %arg2[%c0_2, %c0_3] : memref<32x64xf32, #tpu.memory_space<vmem>>, vector<32x64xf32>
    %3 = arith.truncf %1 : vector<8x32xf32> to vector<8x32xbf16>
    %4 = arith.truncf %2 : vector<32x64xf32> to vector<32x64xbf16>
    %cst = arith.constant dense<0.000000e+00> : vector<8x64xf32>
    %5 = tpu.matmul %3, %4, %cst {dimension_numbers = #tpu.dot_dimension_numbers<[1], [0], [0], [1], [0, 0, 1, 1], [], []>} : vector<8x32xbf16>, vector<32x64xbf16>, vector<8x64xf32> -> vector<8x64xf32>
    %c0_4 = arith.constant 0 : index
    %c0_5 = arith.constant 0 : index
    %6 = vector.load %arg3[%c0_4, %c0_5] : memref<1x64xf32, #tpu.memory_space<vmem>>, vector<1x64xf32>
    %7 = vector.broadcast %6 : vector<1x64xf32> to vector<8x64xf32>
    %8 = arith.addf %5, %7 : vector<8x64xf32>
    %cst_6 = arith.constant 0.000000e+00 : f32
    %9 = vector.broadcast %cst_6 : f32 to vector<8x64xf32>
    %10 = arith.maximumf %8, %9 : vector<8x64xf32>
    %c0_7 = arith.constant 0 : index
    %c0_8 = arith.constant 0 : index
    %11 = vector.load %arg4[%c0_7, %c0_8] : memref<64x32xf32, #tpu.memory_space<vmem>>, vector<64x32xf32>
    %12 = arith.truncf %10 : vector<8x64xf32> to vector<8x64xbf16>
    %13 = arith.truncf %11 : vector<64x32xf32> to vector<64x32xbf16>
    %cst_9 = arith.constant dense<0.000000e+00> : vector<8x32xf32>
    %14 = tpu.matmul %12, %13, %cst_9 {dimension_numbers = #tpu.dot_dimension_numbers<[1], [0], [0], [1], [0, 0, 1, 1], [], []>} : vector<8x64xbf16>, vector<64x32xbf16>, vector<8x32xf32> -> vector<8x32xf32>
    %c0_10 = arith.constant 0 : index
    %c0_11 = arith.constant 0 : index
    %15 = vector.load %arg5[%c0_10, %c0_11] : memref<1x32xf32, #tpu.memory_space<vmem>>, vector<1x32xf32>
    %16 = vector.broadcast %15 : vector<1x32xf32> to vector<8x32xf32>
    %17 = arith.addf %14, %16 : vector<8x32xf32>
    %c0_12 = arith.constant 0 : index
    %c0_13 = arith.constant 0 : index
    %18 = vector.load %arg6[%c0_12, %c0_13] : memref<1x32xf32, #tpu.memory_space<vmem>>, vector<1x32xf32>
    %c0_14 = arith.constant 0 : index
    %c0_15 = arith.constant 0 : index
    %19 = vector.load %arg7[%c0_14, %c0_15] : memref<1x32xf32, #tpu.memory_space<vmem>>, vector<1x32xf32>
    %20 = arith.addf %1, %17 : vector<8x32xf32>
    %cst_16 = arith.constant dense<0.000000e+00> : vector<8xf32>
    %21 = vector.multi_reduction <add>, %20, %cst_16 [1] : vector<8x32xf32> to vector<8xf32>
    %22 = vector.shape_cast %21 : vector<8xf32> to vector<8x1xf32>
    %cst_17 = arith.constant 3.200000e+01 : f32
    %23 = vector.broadcast %cst_17 : f32 to vector<8x1xf32>
    %24 = arith.divf %22, %23 : vector<8x1xf32>
    %25 = vector.broadcast %24 : vector<8x1xf32> to vector<8x32xf32>
    %26 = arith.subf %20, %25 : vector<8x32xf32>
    %27 = arith.mulf %26, %26 : vector<8x32xf32>
    %cst_18 = arith.constant dense<0.000000e+00> : vector<8xf32>
    %28 = vector.multi_reduction <add>, %27, %cst_18 [1] : vector<8x32xf32> to vector<8xf32>
    %29 = vector.shape_cast %28 : vector<8xf32> to vector<8x1xf32>
    %cst_19 = arith.constant 3.200000e+01 : f32
    %30 = vector.broadcast %cst_19 : f32 to vector<8x1xf32>
    %31 = arith.divf %29, %30 : vector<8x1xf32>
    %32 = vector.broadcast %24 : vector<8x1xf32> to vector<8x32xf32>
    %33 = arith.subf %20, %32 : vector<8x32xf32>
    %cst_20 = arith.constant 9.99999974E-6 : f32
    %34 = vector.broadcast %cst_20 : f32 to vector<8x1xf32>
    %35 = arith.addf %31, %34 : vector<8x1xf32>
    %36 = math.rsqrt %35 : vector<8x1xf32>
    %37 = vector.broadcast %36 : vector<8x1xf32> to vector<8x32xf32>
    %38 = arith.mulf %33, %37 : vector<8x32xf32>
    %39 = vector.broadcast %18 : vector<1x32xf32> to vector<8x32xf32>
    %40 = arith.mulf %38, %39 : vector<8x32xf32>
    %41 = vector.broadcast %19 : vector<1x32xf32> to vector<8x32xf32>
    %42 = arith.addf %40, %41 : vector<8x32xf32>
    %c0_21 = arith.constant 0 : index
    %c0_22 = arith.constant 0 : index
    %c0_23 = arith.constant 0 : index
    %43 = vector.load %arg8[%c0_21, %c0_22, %c0_23] : memref<1x8x32xf32, #tpu.memory_space<vmem>>, vector<1x8x32xf32>
    %44 = vector.shape_cast %43 : vector<1x8x32xf32> to vector<8x32xf32>
    %45 = vector.shape_cast %42 : vector<8x32xf32> to vector<1x8x32xf32>
    tpu.vector_store %arg8[%c0_21, %c0_22, %c0_23], %45 {strides = array<i32>} : memref<1x8x32xf32, #tpu.memory_space<vmem>>, vector<1x8x32xf32>,
    return
  }
  func.func @transform_0(%arg0: i32) -> (i32, i32, i32) {
    %c0_i32 = arith.constant 0 : i32
    %c0_i32_0 = arith.constant 0 : i32
    %c0_i32_1 = arith.constant 0 : i32
    return %arg0, %c0_i32, %c0_i32_0 : i32, i32, i32
  }
  func.func @transform_1(%arg0: i32) -> (i32, i32) {
    %c0_i32 = arith.constant 0 : i32
    %c0_i32_0 = arith.constant 0 : i32
    %c0_i32_1 = arith.constant 0 : i32
    return %c0_i32, %c0_i32_0 : i32, i32
  }
  func.func @transform_2(%arg0: i32) -> (i32, i32) {
    %c0_i32 = arith.constant 0 : i32
    %c0_i32_0 = arith.constant 0 : i32
    %c0_i32_1 = arith.constant 0 : i32
    return %c0_i32, %c0_i32_0 : i32, i32
  }
  func.func @transform_3(%arg0: i32) -> (i32, i32) {
    %c0_i32 = arith.constant 0 : i32
    %c0_i32_0 = arith.constant 0 : i32
    %c0_i32_1 = arith.constant 0 : i32
    return %c0_i32, %c0_i32_0 : i32, i32
  }
  func.func @transform_4(%arg0: i32) -> (i32, i32) {
    %c0_i32 = arith.constant 0 : i32
    %c0_i32_0 = arith.constant 0 : i32
    %c0_i32_1 = arith.constant 0 : i32
    return %c0_i32, %c0_i32_0 : i32, i32
  }
  func.func @transform_5(%arg0: i32) -> (i32, i32) {
    %c0_i32 = arith.constant 0 : i32
    %c0_i32_0 = arith.constant 0 : i32
    %c0_i32_1 = arith.constant 0 : i32
    return %c0_i32, %c0_i32_0 : i32, i32
  }
  func.func @transform_6(%arg0: i32) -> (i32, i32) {
    %c0_i32 = arith.constant 0 : i32
    %c0_i32_0 = arith.constant 0 : i32
    %c0_i32_1 = arith.constant 0 : i32
    return %c0_i32, %c0_i32_0 : i32, i32
  }
  func.func @transform_7(%arg0: i32) -> (i32, i32, i32) {
    %c0_i32 = arith.constant 0 : i32
    %c0_i32_0 = arith.constant 0 : i32
    %c0_i32_1 = arith.constant 0 : i32
    return %arg0, %c0_i32, %c0_i32_0 : i32, i32, i32
  }
}

</mosaic_0001>

<bundles_post_ra>
// kernel: decoder_forward.7
= control target key start
LH: loop header
LB: loop body
LE: loop exit
PB: predicated region body
PF: predicated region fallthrough
CT: control target
= control target key end

     0   :  { %s219_s9 = smov 0   ;;  %s247_s0 = inlined_call_operand.vmem [shape: f32[2,8,32], index: 0, kind: input, shape index: {}]   ;;  %s248_s1 = inlined_call_operand.vmem [shape: f32[1,8,32], index: 1, kind: input, shape index: {}]   ;;  %s249_s2 = inlined_call_operand.vmem [shape: f32[2,8,32], index: 2, kind: output, shape index: {}]  }
   0x1 LB: > { %s198_s10 = sadd.s32 4294967295, %s221_s9   ;;  %p202_p0 = scmp.ge.s32.totalorder %s221_s9, 1  ;;  %s221_s9 = sphi %s219_s9, %s12_s9  }
   0x2   : > { %p111_p1 = scmp.lt.s32.totalorder %s221_s9, 3 }
   0x4   : > { %p112_p2 = pnand %p202_p0, %p111_p1 }
   0x5   : > { %p131_p3 = scmp.lt.s32.totalorder (!%p112_p2), %s198_s10, 1 }
   0x6   : > { %115 = sbr.rel (%p112_p2) target bundleno = 20 (0x14), region = 28 }
   0xb   : > { %s251_s10 = smov (!%p131_p3, %s198_s10), 1  ;;  %v141_v1 = vld [vmem:[%s248_s1] sm:$0xff]  ;;  %vm143_vm0 = vcmask 261120  }
   0xc   : > { %s203_s11 = sshll.u32 %s251_s10, 3 }
   0xd   : > { %s134_s14 = scalar_lea.vmem %s247_s0, %s203_s11  ;;  %s138_s19 = scalar_lea.vmem %s249_s2, %s203_s11 }
   0xe   : > { %v139_v0 = vld [vmem:[%s134_s14] sm:$0xff] }
   0xf   : > { %v140_v2 = vmul.f32 2.0, %v139_v0 }
  0x11   : > { %v142_v3 = vadd.f32 %v141_v1, %v140_v2 }
  0x13   : > { %144 = vst.msk [vmem:[%s138_s19] sm:$0xff] %vm143_vm0, %v142_v3 }
  0x14 PF: > { %s12_s9 = sadd.s32 1, %s221_s9  }
  0x15   : > { %p9_p4 = scmp.ge.s32.totalorder %s12_s9, 4  }
  0x17   :  { %11 = sbr.rel (!%p9_p4) target bundleno = 1 (0x1), region = 58 }

// kernel: decoder_forward.8
= control target key start
LH: loop header
LB: loop body
LE: loop exit
PB: predicated region body
PF: predicated region fallthrough
CT: control target
= control target key end

     0   :  { %16 = vsyncpa [#allocation3], 0  ;;  %s1865_s0 = inlined_call_operand.vmem [shape: f32[2,8,32], index: 0, kind: input, shape index: {}, may-alias: {0,1}]   ;;  %s1866_s1 = inlined_call_operand.vmem [shape: f32[2,8,32], index: 1, kind: input, shape index: {}, may-alias: {0,1}]   ;;  %s1867_s2 = inlined_call_operand.vmem [shape: f32[1,1,8,8], index: 2, kind: input, shape index: {}]   ;;  %s1868_s3 = inlined_call_operand.vmem [shape: f32[32,32], index: 3, kind: input, shape index: {}]   ;;  %s1869_s4 = inlined_call_operand.vmem [shape: f32[1,32], index: 4, kind: input, shape index: {}]   ;;  %s1870_s5 = inlined_call_operand.vmem [shape: f32[32,64], index: 5, kind: input, shape index: {}]   ;;  %s1871_s6 = inlined_call_operand.hbm [shape: f32[1,64], index: 6, kind: input, shape index: {}]   ;;  %s1872_s7 = inlined_call_operand.vmem [shape: f32[32,32], index: 7, kind: input, shape index: {}]   ;;  %s1873_s8 = inlined_call_operand.hbm [shape: f32[1,32], index: 8, kind: input, shape index: {}]   ;;  %s1874_s9 = inlined_call_operand.hbm [shape: f32[1,32], index: 9, kind: input, shape index: {}]   ;;  %s1875_s10 = inlined_call_operand.hbm [shape: f32[1,32], index: 10, kind: input, shape index: {}]   ;;  %s1876_s11 = inlined_call_operand.vmem [shape: f32[2,8,32], index: 11, kind: output, shape index: {}]  }
   0x1   :  { %17 = vsyncpa [#allocation5], 0 }
   0x2   :  { %18 = vsyncpa [#allocation8], 0  ;;  %s1635_s17 = smov 0  }
   0x3 LB: > { %s1641_s18 = sadd.s32 4294967295, %s1557_s17   ;;  %p1227_p0 = scmp.ge.s32.totalorder %s1557_s17, 1  ;;  %s1557_s17 = sphi %s1635_s17, %s24_s17  }
   0x4   : > { %p296_p1 = scmp.lt.s32.totalorder %s1557_s17, 3  ;;  %p1877_p2 = scmp.eq.s32.totalorder %s1641_s18, 0 }
   0x5   : > { %s1559_s19 = smov [#allocation4]   ;;  %s1560_s22 = smov [#allocation2]  }
   0x6   : > { %s335_s20 = sshll.u32 %s1559_s19, 4  ;;  %p1646_p3 = pnand %p1227_p0, %p296_p1  ;;  %s336_s20 = int_to_ptr.vmem [resolvable:$true] %s335_s20 }
   0x7   : > { %s321_s23 = sshll.u32 %s1560_s22, 4  ;;  %s1561_s24 = smov [#allocation6]   ;;  %s322_s23 = int_to_ptr.vmem [resolvable:$true] %s321_s23 }
   0x8   : > { %p1372_p4 = pneg %p1646_p3  ;;  %s346_s25 = sshll.u32 %s1561_s24, 4  ;;  %s1658_s25 = int_to_ptr.vmem [resolvable:$true] %s346_s25 }
   0x9   : > { %s1562_s27 = smov [#allocation7]   ;;  %s1446_s29 = scalar_lea.vmem %s336_s20, 16 }
   0xa   : > { %p1654_p5 = pnand %p1877_p2, %p1372_p4  ;;  %s357_s28 = sshll.u32 %s1562_s27, 4  ;;  %s1660_s28 = int_to_ptr.vmem [resolvable:$true] %s357_s28 }
   0xb   : > { %p1447_p7 = scmp.ne.s32.totalorder %s336_s20, %s1446_s29  ;;  %s1453_s30 = scalar_lea.vmem %s336_s20, 32 }
   0xc   : > { %p1437_p6 = pneg %p1654_p5  ;;  %p1454_p10 = scmp.lt.s32.totalorder %s336_s20, %s336_s20 }
   0xd   : > { %p1455_p11 = scmp.lt.s32.totalorder %s1453_s30, %s1446_s29 }
   0xe   : > { %p1449_p8 = pnand %p1447_p7, %p1437_p6 }
   0xf   : > { %p1456_p12 = por %p1455_p11, %p1454_p10 }
  0x10   : > { %p1450_p9 = pneg %p1449_p8 }
  0x12   : > { %p1457_p13 = pnand %p1456_p12, %p1450_p9 }
  0x14   : > { %1460 = shalt.err (!%p1457_p13)
}
  0x15   : > { %1378 = dma.hbm_to_vmem [thread:$0]  (!%p1654_p5), %s1873_s8, 16, %s336_s20, [#allocation5]  }
  0x16   : > { %s1472_s14 = scalar_lea.vmem %s322_s23, 16  ;;  %s1479_s15 = scalar_lea.vmem %s322_s23, 32 }
  0x17   : > { %p1473_p0 = scmp.ne.s32.totalorder %s322_s23, %s1472_s14  ;;  %p1480_p7 = scmp.lt.s32.totalorder %s322_s23, %s322_s23 }
  0x18   : > { %p1481_p8 = scmp.lt.s32.totalorder %s1479_s15, %s1472_s14 }
  0x19   : > { %p1475_p1 = pnand %p1473_p0, %p1437_p6 }
  0x1a   : > { %p1482_p2 = por %p1481_p8, %p1480_p7 }
  0x1b   : > { %p1476_p4 = pneg %p1475_p1 }
  0x1d   : > { %p1483_p10 = pnand %p1482_p2, %p1476_p4 }
  0x1f   : > { %1486 = shalt.err (!%p1483_p10)
}
  0x20   : > { %1375 = dma.hbm_to_vmem [thread:$0]  (!%p1654_p5), %s1871_s6, 16, %s322_s23, [#allocation3]  }
  0x21   : > { %s1498_s20 = scalar_lea.vmem %s1658_s25, 16  ;;  %s1505_s22 = scalar_lea.vmem %s1658_s25, 32 }
  0x22   : > { %p1499_p9 = scmp.ne.s32.totalorder %s1658_s25, %s1498_s20  ;;  %p1506_p2 = scmp.lt.s32.totalorder %s1658_s25, %s1658_s25 }
  0x23   : > { %p1507_p13 = scmp.lt.s32.totalorder %s1505_s22, %s1498_s20 }
  0x24   : > { %p1501_p11 = pnand %p1499_p9, %p1437_p6 }
  0x25   : > { %p1508_p0 = por %p1507_p13, %p1506_p2 }
  0x26   : > { %p1502_p12 = pneg %p1501_p11 }
  0x28   : > { %p1509_p1 = pnand %p1508_p0, %p1502_p12 }
  0x2a   : > { %1512 = shalt.err (!%p1509_p1)
}
  0x2b   : > { %1381 = dma.hbm_to_vmem [thread:$0]  (!%p1654_p5), %s1874_s9, 16, %s1658_s25, [#allocation5]  }
  0x2c   : > { %s1524_s23 = scalar_lea.vmem %s1660_s28, 16  ;;  %s1531_s29 = scalar_lea.vmem %s1660_s28, 32 }
  0x2d   : > { %p1525_p4 = scmp.ne.s32.totalorder %s1660_s28, %s1524_s23  ;;  %p1532_p10 = scmp.lt.s32.totalorder %s1660_s28, %s1660_s28 }
  0x2e   : > { %p1533_p9 = scmp.lt.s32.totalorder %s1531_s29, %s1524_s23 }
  0x2f   : > { %p1527_p7 = pnand %p1525_p4, %p1437_p6 }
  0x30   : > { %p1534_p11 = por %p1533_p9, %p1532_p10 }
  0x31   : > { %p1528_p8 = pneg %p1527_p7 }
  0x33   : > { %p1535_p12 = pnand %p1534_p11, %p1528_p8 }
  0x35   : > { %1538 = shalt.err (!%p1535_p12)
}
  0x36   : > { %1384 = dma.hbm_to_vmem [thread:$0]  (!%p1654_p5), %s1875_s10, 16, %s1660_s28, [#allocation8]  }
  0x37   : > { %384 = sbr.rel (%p1646_p3) target bundleno = 1748 (0x6d4), region = 64  ;;  %p1880_p6 = scmp.eq.s32.totalorder (!%p1646_p3), %s1641_s18, 0 }
  0x3c   : > { %1544 = dma.done.wait (%p1880_p6), [#allocation3], 16   ;;  %p1881_p2 = pmov %p1880_p6 }
  0x3e   : > { %1546 = vsyncadd (%p1881_p2), [#allocation3], 4294967280  ;;  %p1882_p13 = pmov %p1881_p2 }
  0x3f   : > { %p1883_p0 = pmov %p1881_p2 }
  0x40   : > { %1548 = dma.done.wait (%p1882_p13), [#allocation5], 32  }
  0x41   : > { %1550 = vsyncadd (%p1883_p0), [#allocation5], 4294967264  ;;  %p1884_p1 = pmov %p1883_p0 }
  0x42   : > { %p1885_p5 = pmov %p1883_p0 }
  0x43   : > { %1552 = dma.done.wait (%p1884_p1), [#allocation8], 16  }
  0x44   : > { %1554 = vsyncadd (%p1885_p5), [#allocation8], 4294967280  ;;  %p438_p3 = scmp.lt.s32.totalorder %s1641_s18, 1  ;;  %v1563_v0 = vmov 0.0   ;;  %vm1564_vm0 = vmmov 0   ;;  %v456_v1 = vld [vmem:[%s1868_s3 + $0x10] sm:$0xff] }
  0x45   : > { %1284 = vmatprep.subr.bf16.mxu0 %v1563_v0  ;;  %1292 = vmatprep.subr.bf16.mxu1 %v1563_v0  ;;  %v457_v2 = vld [vmem:[%s1868_s3 + $0x18] sm:$0xff]  ;;  %v515_v3 = vld [vmem:[%s1870_s5 + $0x10] sm:$0xff]  ;;  %v454_v6 = vld [vmem:[%s1868_s3] sm:$0xff]  ;;  %vm468_vm1 = vcmask 261120   ;;  %vm573_vm2 = vcmask 64512   ;;  %s1565_s19 = smov 112  }
  0x46   : > { %1288 = vmatprep.mubr.msk.bf16.mxu0 %vm1564_vm0, %v1563_v0  ;;  %1296 = vmatprep.mubr.msk.bf16.mxu1 %vm1564_vm0, %v1563_v0  ;;  %s1887_s18 = smov (!%p438_p3, %s1641_s18), 1  ;;  %v460_v4 = vpack.c.bf16 %v457_v2, %v456_v1  ;;  %v516_v5 = vld [vmem:[%s1870_s5 + $0x18] sm:$0xff]  ;;  %v455_v7 = vld [vmem:[%s1868_s3 + $0x8] sm:$0xff]  ;;  %v513_v9 = vld [vmem:[%s1870_s5] sm:$0xff]  ;;  %s1568_s27 = smov 96   ;;  %vm638_vm3 = vcmask 1043456  }
  0x47   : > { %s1730_s21 = sshll.u32 %s1887_s18, 3  ;;  %v519_v8 = vpack.c.bf16 %v516_v5, %v515_v3  ;;  %v514_v10 = vld [vmem:[%s1870_s5 + $0x8] sm:$0xff]  ;;  %v459_v11 = vpack.c.bf16 %v455_v7, %v454_v6  ;;  %v1241_v17 = vld [vmem:[%s1869_s4] ss:$0 sm:$0xff]  ;;  %s1567_s18 = smov 104   ;;  %vm1026_vm4 = vcmask 130048  }
  0x48   : > { %s441_s20 = scalar_lea.vmem %s1865_s0, %s1730_s21  ;;  %s445_s25 = scalar_lea.vmem %s1866_s1, %s1730_s21  ;;  %1285 = vmatpush3.bf16.msra.mxu0 %v460_v4  ;;  %v518_v13 = vpack.c.bf16 %v514_v10, %v513_v9  ;;  %v1243_v18 = vld [vmem:[#allocation2] ss:$0 sm:$0xff]  ;;  %vm1028_vm5 = vcmask 195584  }
  0x49   : > { %v1764_v12 = vld [vmem:[%s441_s20] sm:$0xff]  ;;  %1293 = vmatpush3.bf16.msra.mxu1 %v519_v8  ;;  %1286 = vmatprep.subr.bf16.mxu0 %v1563_v0  ;;  %s1566_s20 = smov 120   ;;  %s1569_s23 = smov 80  }
  0x4a   : > { %v452_v14 = vld [vmem:[%s445_s25] sm:$0xff]  ;;  %1294 = vmatprep.subr.bf16.mxu1 %v1563_v0  ;;  %v458_v15 = vpack.c.bf16 %v1764_v12, %v1764_v12  ;;  %s1570_s29 = smov 72   ;;  %s1571_s30 = smov 88  }
  0x4b   : > { %v517_v16 = vpack.c.bf16 %v452_v14, %v452_v14  ;;  %v453_v42 = vld [vmem:[%s1867_s2] sm:$0xff]  ;;  %s1572_s13 = smov 8  }
  0x4c   : > { %1287 = vmatpush3.bf16.msra.mxu0 %v459_v11  ;;  %v570_v43 = vmul.f32 -1e+09, %v453_v42 }
  0x4d   : > { %1295 = vmatpush3.bf16.msra.mxu1 %v518_v13  ;;  %1300 = vmatprep.subr.bf16.mxu0 %v1563_v0 }
  0x4e   : > { %1306 = vmatprep.subr.bf16.mxu1 %v1563_v0 }
  0x4f   : > { %1289 = vmatmul.mubr.msk.bf16.vlgmr.msra.gmra.mxu0 %vm468_vm1, %v458_v15 }
  0x50   : > { %1297 = vmatmul.mubr.msk.bf16.vlgmr.msra.gmra.mxu1 %vm468_vm1, %v517_v16  ;;  %1302 = vmatprep.mubr.msk.bf16.mxu0 %vm1564_vm0, %v1563_v0 }
  0x51   : > { %1308 = vmatprep.mubr.msk.bf16.mxu1 %vm1564_vm0, %v1563_v0 }
 0x10f   : > { %v506_v19 = vpop.f32.mrf.mxu0 }
 0x110   : > { %v507_v20 = vadd.f32 %v1241_v17, %v506_v19  ;;  %v564_v21 = vpop.f32.mrf.mxu1 }
 0x111   : > { %v565_v22 = vadd.f32 %v1243_v18, %v564_v21  ;;  %v1290_v23 = vpop.f32.mrf.mxu0 }
 0x112   : > { %v512_v24 = vmul.f32 0.35355338, %v507_v20  ;;  %v1298_v25 = vpop.f32.mrf.mxu1 }
 0x113   : > { %v1781_v26 = vpack.c.bf16 %v565_v22, %v565_v22  ;;  %v509_v27 = vpop.f32.mrf.mxu0 }
 0x114   : > { %v567_v28 = vpop.f32.mrf.mxu1  ;;  %v571_v29 = vpack.c.bf16 %v512_v24, %v512_v24 }
 0x115   : > { %795 = vrot.lane.b32.xlu1 %v1781_v26, %s1565_s19  ;;  %685 = vrot.lane.b32.xlu0 %v1781_v26, %s1566_s20  ;;  %v1291_v30 = vpop.f32.mrf.mxu0  ;;  %v578_v31 = vsel %vm573_vm2, %v1781_v26, 0 }
 0x116   : > { %v1299_v32 = vpop.f32.mrf.mxu1  ;;  %1301 = vmatpush3.bf16.xpose.msra.mxu0 %v578_v31 }
 0x117   : > { %1312 = vmatprep.subr.bf16.mxu0 %v1563_v0 }
 0x119   : > { %793 = vrot.lane.b32.xlu1 %v571_v29, %s1565_s19  ;;  %683 = vrot.lane.b32.xlu0 %v571_v29, %s1566_s20  ;;  %s1573_s20 = smov 16  }
 0x11d   : > { %903 = vrot.lane.b32.xlu1 %v571_v29, %s1567_s18  ;;  %905 = vrot.lane.b32.xlu0 %v1781_v26, %s1567_s18  ;;  %s1574_s18 = smov 24  }
 0x11e   : > { %1303 = vmatmul.mubr.msk.bf16.vlgmr.msra.gmra.mxu0 %vm573_vm2, %v571_v29 }
 0x11f   : > { %1314 = vmatprep.mubr.msk.bf16.mxu0 %vm1564_vm0, %v1563_v0 }
 0x187   : > { %v686_v33 = vpop.permute.xlu0 %685  ;;  %v796_v35 = vpop.permute.xlu1 %795 }
 0x188   : > { %v691_v34 = vsel %vm573_vm2, %v686_v33, 0  ;;  %v801_v37 = vsel %vm573_vm2, %v796_v35, 0 }
 0x189   : > { %1313 = vmatpush3.bf16.xpose.msra.mxu0 %v691_v34 }
 0x18a   : > { %1324 = vmatprep.subr.bf16.mxu0 %v1563_v0 }
 0x18b   : > { %v684_v36 = vpop.permute.xlu0 %683  ;;  %v794_v39 = vpop.permute.xlu1 %793 }
 0x18f   : > { %v906_v38 = vpop.permute.xlu0 %905  ;;  %v904_v41 = vpop.permute.xlu1 %903 }
 0x190   : > { %1315 = vmatmul.mubr.msk.bf16.vlgmr.msra.gmra.mxu0 %vm573_vm2, %v684_v36  ;;  %v911_v40 = vsel %vm573_vm2, %v906_v38, 0 }
 0x191   : > { %1325 = vmatpush3.bf16.xpose.msra.mxu0 %v801_v37  ;;  %1326 = vmatprep.mubr.msk.bf16.mxu0 %vm1564_vm0, %v1563_v0 }
 0x192   : > { %1336 = vmatprep.subr.bf16.mxu0 %v1563_v0 }
 0x198   : > { %1327 = vmatmul.mubr.msk.bf16.vlgmr.msra.gmra.mxu0 %vm573_vm2, %v794_v39 }
 0x199   : > { %1337 = vmatpush3.bf16.xpose.msra.mxu0 %v911_v40  ;;  %1338 = vmatprep.mubr.msk.bf16.mxu0 %vm1564_vm0, %v1563_v0 }
 0x19a   : > { %1348 = vmatprep.subr.bf16.mxu0 %v1563_v0 }
 0x1a0   : > { %1339 = vmatmul.mubr.msk.bf16.vlgmr.msra.gmra.mxu0 %vm573_vm2, %v904_v41 }
 0x1a1   : > { %1352 = vmatprep.mubr.msk.bf16.mxu0 %vm1564_vm0, %v1563_v0 }
 0x1de   : > { %v614_v44 = vpop.f32.mrf.mxu0 }
 0x1df   : > { %v615_v45 = vadd.f32 %v614_v44, %v570_v43 }
 0x1e0   : > { %v1304_v46 = vpop.f32.mrf.mxu0 }
 0x1e1   : > { %v620_v47 = vsel %vm573_vm2, %v615_v45, -inf }
 0x1e2   : > { %621 = vmax.xlane.f32.xlu0 %v620_v47  ;;  %v617_v48 = vpop.f32.mrf.mxu0 }
 0x1e4   : > { %v1305_v49 = vpop.f32.mrf.mxu0 }
 0x250   : > { %v727_v50 = vpop.f32.mrf.mxu0 }
 0x251   : > { %v728_v51 = vadd.f32 %v727_v50, %v570_v43 }
 0x252   : > { %v1316_v52 = vpop.f32.mrf.mxu0 }
 0x253   : > { %v733_v53 = vsel %vm573_vm2, %v728_v51, -inf }
 0x254   : > { %734 = vmax.xlane.f32.xlu1 %v733_v53  ;;  %v730_v54 = vpop.f32.mrf.mxu0 }
 0x255   : > { %v1032_v54 = vld [vmem:[%s1872_s7 + $0x10] sm:$0xff] }
 0x256   : > { %v1317_v55 = vpop.f32.mrf.mxu0 }
 0x257   : > { %v1033_v55 = vld [vmem:[%s1872_s7 + $0x18] sm:$0xff] }
 0x258   : > { %v837_v56 = vpop.f32.mrf.mxu0 }
 0x259   : > { %v838_v57 = vadd.f32 %v837_v56, %v570_v43  ;;  %v1036_v56 = vpack.c.bf16 %v1033_v55, %v1032_v54 }
 0x25a   : > { %v1328_v58 = vpop.f32.mrf.mxu0 }
 0x25b   : > { %v843_v59 = vsel %vm573_vm2, %v838_v57, -inf  ;;  %1349 = vmatpush3.bf16.msra.mxu0 %v1036_v56 }
 0x25c   : > { %844 = vmax.xlane.f32.xlu0 %v843_v59  ;;  %v840_v60 = vpop.f32.mrf.mxu0  ;;  %1350 = vmatprep.subr.bf16.mxu0 %v1563_v0  ;;  %v1030_v59 = vld [vmem:[%s1872_s7] sm:$0xff] }
 0x25d   : > { %v1031_v60 = vld [vmem:[%s1872_s7 + $0x8] sm:$0xff] }
 0x25e   : > { %v1329_v61 = vpop.f32.mrf.mxu0 }
 0x25f   : > { %v1035_v61 = vpack.c.bf16 %v1031_v60, %v1030_v59 }
 0x260   : > { %v947_v62 = vpop.f32.mrf.mxu0 }
 0x261   : > { %v948_v63 = vadd.f32 %v947_v62, %v570_v43  ;;  %1351 = vmatpush3.bf16.msra.mxu0 %v1035_v61 }
 0x262   : > { %v1340_v1 = vpop.f32.mrf.mxu0 }
 0x263   : > { %v953_v2 = vsel %vm573_vm2, %v948_v63, -inf }
 0x264   : > { %954 = vmax.xlane.f32.xlu0 %v953_v2  ;;  %v950_v3 = vpop.f32.mrf.mxu0 }
 0x266   : > { %v1341_v4 = vpop.f32.mrf.mxu0 }
 0x26b   : > { %v622_v5 = vpop.xlane.xlu0 %621 }
 0x26c   : > { %v623_v6 = vsub.f32 %v615_v45, %v622_v5 }
 0x26e   : > { %v624_v7 = vmul.f32 1.442695, %v623_v6 }
 0x270   : > { %1417 = vpow2.f32 %v624_v7 }
 0x27d   : > { %v1418_v8 = vpop.eup %1417 }
 0x27e   : > { %v626_v9 = vsel %vm573_vm2, %v1418_v8, 0.0 }
 0x27f   : > { %627 = vadd.xlane.f32.xlu1 %v626_v9 }
 0x290   : > { %633 = vrot.lane.b32.xlu1 %v1781_v26, %s1568_s27  ;;  %s449_s27 = scalar_lea.vmem %s1876_s11, %s1730_s21 }
 0x2dd   : > { %v735_v10 = vpop.xlane.xlu1 %734 }
 0x2de   : > { %v736_v11 = vsub.f32 %v728_v51, %v735_v10 }
 0x2e0   : > { %v737_v13 = vmul.f32 1.442695, %v736_v11 }
 0x2e2   : > { %1419 = vpow2.f32 %v737_v13 }
 0x2e5   : > { %v845_v14 = vpop.xlane.xlu0 %844 }
 0x2e6   : > { %v846_v15 = vsub.f32 %v838_v57, %v845_v14 }
 0x2e8   : > { %v847_v16 = vmul.f32 1.442695, %v846_v15 }
 0x2ea   : > { %1421 = vpow2.f32 %v847_v16  ;;  %v1253_v16 = vld [vmem:[#allocation4] ss:$0 sm:$0xff] }
 0x2ed   : > { %v955_v17 = vpop.xlane.xlu0 %954 }
 0x2ee   : > { %v956_v18 = vsub.f32 %v948_v63, %v955_v17 }
 0x2ef   : > { %v1420_v19 = vpop.eup %1419 }
 0x2f0   : > { %v957_v20 = vmul.f32 1.442695, %v956_v18  ;;  %v739_v21 = vsel %vm573_vm2, %v1420_v19, 0.0 }
 0x2f1   : > { %740 = vadd.xlane.f32.xlu0 %v739_v21 }
 0x2f2   : > { %1423 = vpow2.f32 %v957_v20 }
 0x2f7   : > { %v1422_v22 = vpop.eup %1421 }
 0x2f8   : > { %v849_v23 = vsel %vm573_vm2, %v1422_v22, 0.0 }
 0x2f9   : > { %850 = vadd.xlane.f32.xlu1 %v849_v23 }
 0x2ff   : > { %v1424_v24 = vpop.eup %1423 }
 0x300   : > { %v959_v25 = vsel %vm573_vm2, %v1424_v24, 0.0 }
 0x301   : > { %960 = vadd.xlane.f32.xlu0 %v959_v25 }
 0x308   : > { %v628_v27 = vpop.xlane.xlu1 %627 }
 0x309   : > { %1425 = vrcp.f32 %v628_v27 }
 0x30a   : > { %855 = vrot.lane.b32.xlu1 %v1781_v26, %s1569_s23 }
 0x30c   : > { %v634_v28 = vpop.permute.xlu1 %633 }
 0x30d   : > { %v640_v29 = vsel %vm638_vm3, %v634_v28, 0 }
 0x30e   : > { %1307 = vmatpush3.bf16.msra.mxu1 %v640_v29  ;;  %965 = vrot.lane.b32.xlu1 %v1781_v26, %s1570_s29 }
 0x30f   : > { %1318 = vmatprep.subr.bf16.mxu1 %v1563_v0 }
 0x316   : > { %v1426_v30 = vpop.eup %1425 }
 0x317   : > { %745 = vrot.lane.b32.xlu0 %v1781_v26, %s1571_s30  ;;  %v630_v31 = vmul.f32 %v1426_v30, %v1418_v8 }
 0x319   : > { %v631_v32 = vpack.c.bf16 %v630_v31, %v630_v31 }
 0x31b   : > { %1309 = vmatmul.mubr.msk.bf16.vlgmr.msra.gmra.mxu1 %vm573_vm2, %v631_v32 }
 0x31c   : > { %1320 = vmatprep.mubr.msk.bf16.mxu1 %vm1564_vm0, %v1563_v0 }
 0x37a   : > { %v741_v33 = vpop.xlane.xlu0 %740 }
 0x37b   : > { %1427 = vrcp.f32 %v741_v33 }
 0x382   : > { %v851_v34 = vpop.xlane.xlu1 %850 }
 0x383   : > { %1429 = vrcp.f32 %v851_v34  ;;  %v1255_v34 = vld [vmem:[#allocation6] ss:$0 sm:$0xff] }
 0x386   : > { %v856_v40 = vpop.permute.xlu1 %855 }
 0x387   : > { %v861_v42 = vsel %vm638_vm3, %v856_v40, 0 }
 0x388   : > { %v1428_v35 = vpop.eup %1427 }
 0x389   : > { %v743_v37 = vmul.f32 %v1428_v35, %v1420_v19  ;;  %v1256_v35 = vld [vmem:[#allocation7] ss:$0 sm:$0xff] }
 0x38a   : > { %v961_v36 = vpop.xlane.xlu0 %960  ;;  %v966_v44 = vpop.permute.xlu1 %965 }
 0x38b   : > { %1431 = vrcp.f32 %v961_v36  ;;  %v744_v26 = vpack.c.bf16 %v743_v37, %v743_v37  ;;  %v971_v47 = vsel %vm638_vm3, %v966_v44, 0 }
 0x38e   : > { %v746_v38 = vpop.permute.xlu0 %745 }
 0x38f   : > { %v751_v39 = vsel %vm638_vm3, %v746_v38, 0 }
 0x390   : > { %1319 = vmatpush3.bf16.msra.mxu1 %v751_v39  ;;  %v1430_v41 = vpop.eup %1429 }
 0x391   : > { %1330 = vmatprep.subr.bf16.mxu1 %v1563_v0  ;;  %v853_v43 = vmul.f32 %v1430_v41, %v1422_v22 }
 0x393   : > { %1321 = vmatmul.mubr.msk.bf16.vlgmr.msra.gmra.mxu1 %vm573_vm2, %v744_v26  ;;  %v854_v45 = vpack.c.bf16 %v853_v43, %v853_v43 }
 0x394   : > { %1331 = vmatpush3.bf16.msra.mxu1 %v861_v42  ;;  %1332 = vmatprep.mubr.msk.bf16.mxu1 %vm1564_vm0, %v1563_v0 }
 0x395   : > { %1342 = vmatprep.subr.bf16.mxu1 %v1563_v0 }
 0x398   : > { %v1432_v46 = vpop.eup %1431 }
 0x399   : > { %v963_v48 = vmul.f32 %v1432_v46, %v1424_v24 }
 0x39b   : > { %1333 = vmatmul.mubr.msk.bf16.vlgmr.msra.gmra.mxu1 %vm573_vm2, %v854_v45  ;;  %v964_v49 = vpack.c.bf16 %v963_v48, %v963_v48 }
 0x39c   : > { %1343 = vmatpush3.bf16.msra.mxu1 %v971_v47  ;;  %1344 = vmatprep.mubr.msk.bf16.mxu1 %vm1564_vm0, %v1563_v0 }
 0x3a3   : > { %1345 = vmatmul.mubr.msk.bf16.vlgmr.msra.gmra.mxu1 %vm573_vm2, %v964_v49 }
 0x3db   : > { %v676_v50 = vpop.f32.mrf.mxu1 }
 0x3dd   : > { %v1310_v51 = vpop.f32.mrf.mxu1 }
 0x3df   : > { %v679_v52 = vpop.f32.mrf.mxu1 }
 0x3e1   : > { %v1311_v53 = vpop.f32.mrf.mxu1 }
 0x453   : > { %v787_v57 = vpop.f32.mrf.mxu1 }
 0x454   : > { %1014 = vrot.lane.b32.xlu0 %v787_v57, %s1572_s13 }
 0x455   : > { %v1322_v58 = vpop.f32.mrf.mxu1 }
 0x457   : > { %v790_v62 = vpop.f32.mrf.mxu1 }
 0x459   : > { %v1323_v63 = vpop.f32.mrf.mxu1 }
 0x45b   : > { %v897_v1 = vpop.f32.mrf.mxu1 }
 0x45c   : > { %1018 = vrot.lane.b32.xlu1 %v897_v1, %s1573_s20 }
 0x45d   : > { %v1334_v2 = vpop.f32.mrf.mxu1 }
 0x45f   : > { %v900_v0 = vpop.f32.mrf.mxu1 }
 0x461   : > { %v1335_v3 = vpop.f32.mrf.mxu1 }
 0x463   : > { %v1007_v4 = vpop.f32.mrf.mxu1 }
 0x464   : > { %1022 = vrot.lane.b32.xlu0 %v1007_v4, %s1574_s18 }
 0x465   : > { %v1346_v5 = vpop.f32.mrf.mxu1 }
 0x467   : > { %v1010_v6 = vpop.f32.mrf.mxu1 }
 0x469   : > { %v1347_v7 = vpop.f32.mrf.mxu1 }
 0x4c6   : > { %v1015_v8 = vpop.permute.xlu0 %1014 }
 0x4c7   : > { %v1025_v10 = vsel %vm573_vm2, %v676_v50, %v1015_v8 }
 0x4ce   : > { %v1019_v9 = vpop.permute.xlu1 %1018 }
 0x4cf   : > { %v1027_v11 = vsel %vm1026_vm4, %v1025_v10, %v1019_v9 }
 0x4d6   : > { %v1023_v13 = vpop.permute.xlu0 %1022 }
 0x4d7   : > { %v1029_v14 = vsel %vm1028_vm5, %v1027_v11, %v1023_v13 }
 0x4d8   : > { %v1034_v15 = vpack.c.bf16 %v1029_v14, %v1029_v14 }
 0x4da   : > { %1353 = vmatmul.mubr.msk.bf16.vlgmr.msra.gmra.mxu0 %vm468_vm1, %v1034_v15 }
 0x59a   : > { %v1081_v17 = vpop.f32.mrf.mxu0 }
 0x59b   : > { %v1082_v18 = vadd.f32 %v1253_v16, %v1081_v17 }
 0x59c   : > { %v1354_v19 = vpop.f32.mrf.mxu0 }
 0x59d   : > { %v1089_v20 = vadd.f32 %v1082_v18, %v1764_v12 }
 0x59e   : > { %v1084_v21 = vpop.f32.mrf.mxu0 }
 0x59f   : > { %v1090_v22 = vsel %vm468_vm1, %v1089_v20, 0.0 }
 0x5a0   : > { %1091 = vadd.xlane.f32.xlu1 %v1090_v22  ;;  %v1355_v23 = vpop.f32.mrf.mxu0 }
 0x629   : > { %v1092_v24 = vpop.xlane.xlu1 %1091 }
 0x62a   : > { %v1094_v25 = vmul.f32 0.03125, %v1092_v24 }
 0x62c   : > { %v1095_v27 = vsub.f32 %v1089_v20, %v1094_v25 }
 0x62e   : > { %v1096_v28 = vmul.f32 %v1095_v27, %v1095_v27 }
 0x630   : > { %v1097_v29 = vsel %vm468_vm1, %v1096_v28, 0.0 }
 0x631   : > { %1098 = vadd.xlane.f32.xlu0 %v1097_v29 }
 0x6ba   : > { %v1099_v30 = vpop.xlane.xlu0 %1098 }
 0x6bb   : > { %v1100_v31 = vmul.f32 0.03125, %v1099_v30 }
 0x6bd   : > { %v1101_v32 = vadd.f32 1e-05, %v1100_v31 }
 0x6bf   : > { %1433 = vrsqrt.f32 %v1101_v32 }
 0x6cc   : > { %v1434_v33 = vpop.eup %1433 }
 0x6cd   : > { %v1103_v12 = vmul.f32 %v1434_v33, %v1095_v27 }
 0x6cf   : > { %v1110_v36 = vmul.f32 %v1255_v34, %v1103_v12 }
 0x6d1   : > { %v1117_v37 = vadd.f32 %v1256_v35, %v1110_v36 }
 0x6d3   : > { %1118 = vst.msk [vmem:[%s449_s27] sm:$0xff] %vm468_vm1, %v1117_v37 }
 0x6d4 PF: > { %s24_s17 = sadd.s32 1, %s1557_s17  }
 0x6d5   : > { %p21_p4 = scmp.ge.s32.totalorder %s24_s17, 4  }
 0x6d7   :  { %23 = sbr.rel (!%p21_p4) target bundleno = 3 (0x3), region = 114 }
 0x6dc   :  { %1138 = vsyncpa [#allocation3], 1 }
 0x6dd   :  { %1140 = vsyncpa [#allocation3 + $0x1], 1 }
 0x6de   :  { %1141 = vsyncpa [#allocation5], 1 }
 0x6df   :  { %1142 = vsyncpa [#allocation8], 1 }

// kernel: decoder_forward.9
= control target key start
LH: loop header
LB: loop body
LE: loop exit
PB: predicated region body
PF: predicated region fallthrough
CT: control target
= control target key end

     0   :  { %s1374_s17 = smov 0   ;;  %s1541_s0 = inlined_call_operand.vmem [shape: f32[2,8,32], index: 0, kind: input, shape index: {}, may-alias: {0,1}]   ;;  %s1542_s1 = inlined_call_operand.vmem [shape: f32[2,8,32], index: 1, kind: input, shape index: {}, may-alias: {0,1}]   ;;  %s1543_s2 = inlined_call_operand.vmem [shape: f32[1,1,8,8], index: 2, kind: input, shape index: {}]   ;;  %s1544_s3 = inlined_call_operand.vmem [shape: f32[32,32], index: 3, kind: input, shape index: {}]   ;;  %s1545_s4 = inlined_call_operand.vmem [shape: f32[1,32], index: 4, kind: input, shape index: {}]   ;;  %s1546_s5 = inlined_call_operand.vmem [shape: f32[32,64], index: 5, kind: input, shape index: {}]   ;;  %s1547_s6 = inlined_call_operand.vmem [shape: f32[1,64], index: 6, kind: input, shape index: {}]   ;;  %s1548_s7 = inlined_call_operand.vmem [shape: f32[32,32], index: 7, kind: input, shape index: {}]   ;;  %s1549_s8 = inlined_call_operand.vmem [shape: f32[1,32], index: 8, kind: input, shape index: {}]   ;;  %s1550_s9 = inlined_call_operand.vmem [shape: f32[1,32], index: 9, kind: input, shape index: {}]   ;;  %s1551_s10 = inlined_call_operand.vmem [shape: f32[1,32], index: 10, kind: input, shape index: {}]   ;;  %s1552_s11 = inlined_call_operand.vmem [shape: f32[2,8,32], index: 11, kind: output, shape index: {}]  }
   0x1 LB: > { %s1133_s18 = sadd.s32 4294967295, %s1300_s17   ;;  %p1137_p0 = scmp.ge.s32.totalorder %s1300_s17, 1  ;;  %s1300_s17 = sphi %s1374_s17, %s21_s17  }
   0x2   : > { %p345_p1 = scmp.lt.s32.totalorder %s1300_s17, 3 }
   0x4   : > { %p346_p2 = pnand %p1137_p0, %p345_p1 }
   0x5   : > { %p1391_p3 = scmp.lt.s32.totalorder (!%p346_p2), %s1133_s18, 1  ;;  %s1304_s29 = smov (!%p346_p2), 112  }
   0x6   : > { %349 = sbr.rel (%p346_p2) target bundleno = 1690 (0x69a), region = 64  ;;  %s1305_s30 = smov (!%p346_p2), 120  }
   0x7   : > { %s1306_s12 = smov (!%p346_p2), 104   ;;  %s1307_s15 = smov (!%p346_p2), 96  }
   0x8   : > { %s1308_s16 = smov (!%p346_p2), 80   ;;  %s1309_s20 = smov (!%p346_p2), 72  }
   0x9   : > { %s1310_s21 = smov (!%p346_p2), 88  }
   0xb   : > { %v405_v0 = vld [vmem:[%s1544_s3 + $0x10] sm:$0xff]  ;;  %v406_v1 = vld [vmem:[%s1544_s3 + $0x18] sm:$0xff]  ;;  %v1302_v3 = vmov 0.0   ;;  %v403_v6 = vld [vmem:[%s1544_s3] sm:$0xff]  ;;  %vm1303_vm0 = vmmov 0   ;;  %s1555_s18 = smov (!%p1391_p3, %s1133_s18), 1 }
   0xc   : > { %v464_v2 = vld [vmem:[%s1546_s5 + $0x10] sm:$0xff]  ;;  %1184 = vmatprep.subr.bf16.mxu0 %v1302_v3  ;;  %1192 = vmatprep.subr.bf16.mxu1 %v1302_v3  ;;  %v409_v4 = vpack.c.bf16 %v406_v1, %v405_v0  ;;  %v465_v5 = vld [vmem:[%s1546_s5 + $0x18] sm:$0xff]  ;;  %v404_v7 = vld [vmem:[%s1544_s3 + $0x8] sm:$0xff]  ;;  %s1419_s19 = sshll.u32 %s1555_s18, 3  ;;  %vm417_vm1 = vcmask 261120   ;;  %vm522_vm2 = vcmask 64512  }
   0xd   : > { %v468_v8 = vpack.c.bf16 %v465_v5, %v464_v2  ;;  %v462_v9 = vld [vmem:[%s1546_s5] sm:$0xff]  ;;  %v463_v10 = vld [vmem:[%s1546_s5 + $0x8] sm:$0xff]  ;;  %1188 = vmatprep.mubr.msk.bf16.mxu0 %vm1303_vm0, %v1302_v3  ;;  %1196 = vmatprep.mubr.msk.bf16.mxu1 %vm1303_vm0, %v1302_v3  ;;  %v408_v11 = vpack.c.bf16 %v404_v7, %v403_v6  ;;  %s390_s22 = scalar_lea.vmem %s1541_s0, %s1419_s19  ;;  %s394_s25 = scalar_lea.vmem %s1542_s1, %s1419_s19  ;;  %vm587_vm3 = vcmask 1043456   ;;  %vm975_vm4 = vcmask 130048  }
   0xe   : > { %1185 = vmatpush3.bf16.msra.mxu0 %v409_v4  ;;  %v467_v12 = vpack.c.bf16 %v463_v10, %v462_v9  ;;  %v1426_v13 = vld [vmem:[%s390_s22] sm:$0xff]  ;;  %s1311_s18 = smov 8   ;;  %vm977_vm5 = vcmask 195584   ;;  %s398_s24 = scalar_lea.vmem %s1552_s11, %s1419_s19 }
   0xf   : > { %1193 = vmatpush3.bf16.msra.mxu1 %v468_v8  ;;  %1186 = vmatprep.subr.bf16.mxu0 %v1302_v3  ;;  %v407_v14 = vpack.c.bf16 %v1426_v13, %v1426_v13  ;;  %v401_v15 = vld [vmem:[%s394_s25] sm:$0xff] }
  0x10   : > { %1194 = vmatprep.subr.bf16.mxu1 %v1302_v3  ;;  %v466_v16 = vpack.c.bf16 %v401_v15, %v401_v15  ;;  %v1141_v17 = vld [vmem:[%s1545_s4] ss:$0 sm:$0xff] }
  0x11   : > { %v1143_v18 = vld [vmem:[%s1547_s6] ss:$0 sm:$0xff] }
  0x12   : > { %1187 = vmatpush3.bf16.msra.mxu0 %v408_v11  ;;  %v402_v42 = vld [vmem:[%s1543_s2] sm:$0xff] }
  0x13   : > { %1195 = vmatpush3.bf16.msra.mxu1 %v467_v12  ;;  %1200 = vmatprep.subr.bf16.mxu0 %v1302_v3  ;;  %v519_v43 = vmul.f32 -1e+09, %v402_v42 }
  0x14   : > { %1206 = vmatprep.subr.bf16.mxu1 %v1302_v3 }
  0x15   : > { %1189 = vmatmul.mubr.msk.bf16.vlgmr.msra.gmra.mxu0 %vm417_vm1, %v407_v14 }
  0x16   : > { %1197 = vmatmul.mubr.msk.bf16.vlgmr.msra.gmra.mxu1 %vm417_vm1, %v466_v16  ;;  %1202 = vmatprep.mubr.msk.bf16.mxu0 %vm1303_vm0, %v1302_v3 }
  0x17   : > { %1208 = vmatprep.mubr.msk.bf16.mxu1 %vm1303_vm0, %v1302_v3 }
  0xd5   : > { %v455_v19 = vpop.f32.mrf.mxu0 }
  0xd6   : > { %v456_v20 = vadd.f32 %v1141_v17, %v455_v19  ;;  %v513_v21 = vpop.f32.mrf.mxu1 }
  0xd7   : > { %v514_v22 = vadd.f32 %v1143_v18, %v513_v21  ;;  %v1190_v23 = vpop.f32.mrf.mxu0 }
  0xd8   : > { %v461_v24 = vmul.f32 0.35355338, %v456_v20  ;;  %v1198_v25 = vpop.f32.mrf.mxu1 }
  0xd9   : > { %v1448_v26 = vpack.c.bf16 %v514_v22, %v514_v22  ;;  %v458_v27 = vpop.f32.mrf.mxu0 }
  0xda   : > { %v516_v28 = vpop.f32.mrf.mxu1  ;;  %v520_v29 = vpack.c.bf16 %v461_v24, %v461_v24 }
  0xdb   : > { %744 = vrot.lane.b32.xlu1 %v1448_v26, %s1304_s29  ;;  %634 = vrot.lane.b32.xlu0 %v1448_v26, %s1305_s30  ;;  %v1191_v30 = vpop.f32.mrf.mxu0  ;;  %v527_v31 = vsel %vm522_vm2, %v1448_v26, 0 }
  0xdc   : > { %v1199_v32 = vpop.f32.mrf.mxu1  ;;  %1201 = vmatpush3.bf16.xpose.msra.mxu0 %v527_v31 }
  0xdd   : > { %1212 = vmatprep.subr.bf16.mxu0 %v1302_v3 }
  0xdf   : > { %742 = vrot.lane.b32.xlu1 %v520_v29, %s1304_s29  ;;  %632 = vrot.lane.b32.xlu0 %v520_v29, %s1305_s30  ;;  %s1312_s30 = smov 16  }
  0xe3   : > { %852 = vrot.lane.b32.xlu1 %v520_v29, %s1306_s12  ;;  %854 = vrot.lane.b32.xlu0 %v1448_v26, %s1306_s12  ;;  %s1313_s12 = smov 24  }
  0xe4   : > { %1203 = vmatmul.mubr.msk.bf16.vlgmr.msra.gmra.mxu0 %vm522_vm2, %v520_v29 }
  0xe5   : > { %1214 = vmatprep.mubr.msk.bf16.mxu0 %vm1303_vm0, %v1302_v3 }
 0x14d   : > { %v635_v33 = vpop.permute.xlu0 %634  ;;  %v745_v35 = vpop.permute.xlu1 %744 }
 0x14e   : > { %v640_v34 = vsel %vm522_vm2, %v635_v33, 0  ;;  %v750_v37 = vsel %vm522_vm2, %v745_v35, 0 }
 0x14f   : > { %1213 = vmatpush3.bf16.xpose.msra.mxu0 %v640_v34 }
 0x150   : > { %1224 = vmatprep.subr.bf16.mxu0 %v1302_v3 }
 0x151   : > { %v633_v36 = vpop.permute.xlu0 %632  ;;  %v743_v39 = vpop.permute.xlu1 %742 }
 0x155   : > { %v855_v38 = vpop.permute.xlu0 %854  ;;  %v853_v41 = vpop.permute.xlu1 %852 }
 0x156   : > { %1215 = vmatmul.mubr.msk.bf16.vlgmr.msra.gmra.mxu0 %vm522_vm2, %v633_v36  ;;  %v860_v40 = vsel %vm522_vm2, %v855_v38, 0 }
 0x157   : > { %1225 = vmatpush3.bf16.xpose.msra.mxu0 %v750_v37  ;;  %1226 = vmatprep.mubr.msk.bf16.mxu0 %vm1303_vm0, %v1302_v3 }
 0x158   : > { %1236 = vmatprep.subr.bf16.mxu0 %v1302_v3 }
 0x15e   : > { %1227 = vmatmul.mubr.msk.bf16.vlgmr.msra.gmra.mxu0 %vm522_vm2, %v743_v39 }
 0x15f   : > { %1237 = vmatpush3.bf16.xpose.msra.mxu0 %v860_v40  ;;  %1238 = vmatprep.mubr.msk.bf16.mxu0 %vm1303_vm0, %v1302_v3 }
 0x160   : > { %1248 = vmatprep.subr.bf16.mxu0 %v1302_v3 }
 0x166   : > { %1239 = vmatmul.mubr.msk.bf16.vlgmr.msra.gmra.mxu0 %vm522_vm2, %v853_v41 }
 0x167   : > { %1252 = vmatprep.mubr.msk.bf16.mxu0 %vm1303_vm0, %v1302_v3 }
 0x1a4   : > { %v563_v44 = vpop.f32.mrf.mxu0 }
 0x1a5   : > { %v564_v45 = vadd.f32 %v563_v44, %v519_v43 }
 0x1a6   : > { %v1204_v46 = vpop.f32.mrf.mxu0 }
 0x1a7   : > { %v569_v47 = vsel %vm522_vm2, %v564_v45, -inf }
 0x1a8   : > { %570 = vmax.xlane.f32.xlu0 %v569_v47  ;;  %v566_v48 = vpop.f32.mrf.mxu0 }
 0x1aa   : > { %v1205_v49 = vpop.f32.mrf.mxu0 }
 0x216   : > { %v676_v50 = vpop.f32.mrf.mxu0 }
 0x217   : > { %v677_v51 = vadd.f32 %v676_v50, %v519_v43 }
 0x218   : > { %v1216_v52 = vpop.f32.mrf.mxu0 }
 0x219   : > { %v682_v53 = vsel %vm522_vm2, %v677_v51, -inf }
 0x21a   : > { %683 = vmax.xlane.f32.xlu1 %v682_v53  ;;  %v679_v54 = vpop.f32.mrf.mxu0 }
 0x21b   : > { %v981_v54 = vld [vmem:[%s1548_s7 + $0x10] sm:$0xff] }
 0x21c   : > { %v1217_v55 = vpop.f32.mrf.mxu0 }
 0x21d   : > { %v982_v55 = vld [vmem:[%s1548_s7 + $0x18] sm:$0xff] }
 0x21e   : > { %v786_v56 = vpop.f32.mrf.mxu0 }
 0x21f   : > { %v787_v57 = vadd.f32 %v786_v56, %v519_v43  ;;  %v985_v56 = vpack.c.bf16 %v982_v55, %v981_v54 }
 0x220   : > { %v1228_v58 = vpop.f32.mrf.mxu0 }
 0x221   : > { %v792_v59 = vsel %vm522_vm2, %v787_v57, -inf  ;;  %1249 = vmatpush3.bf16.msra.mxu0 %v985_v56 }
 0x222   : > { %793 = vmax.xlane.f32.xlu0 %v792_v59  ;;  %v789_v60 = vpop.f32.mrf.mxu0  ;;  %1250 = vmatprep.subr.bf16.mxu0 %v1302_v3  ;;  %v979_v59 = vld [vmem:[%s1548_s7] sm:$0xff] }
 0x223   : > { %v980_v60 = vld [vmem:[%s1548_s7 + $0x8] sm:$0xff] }
 0x224   : > { %v1229_v61 = vpop.f32.mrf.mxu0 }
 0x225   : > { %v984_v61 = vpack.c.bf16 %v980_v60, %v979_v59 }
 0x226   : > { %v896_v62 = vpop.f32.mrf.mxu0 }
 0x227   : > { %v897_v63 = vadd.f32 %v896_v62, %v519_v43  ;;  %1251 = vmatpush3.bf16.msra.mxu0 %v984_v61 }
 0x228   : > { %v1240_v0 = vpop.f32.mrf.mxu0 }
 0x229   : > { %v902_v1 = vsel %vm522_vm2, %v897_v63, -inf }
 0x22a   : > { %903 = vmax.xlane.f32.xlu0 %v902_v1  ;;  %v899_v2 = vpop.f32.mrf.mxu0 }
 0x22c   : > { %v1241_v4 = vpop.f32.mrf.mxu0 }
 0x231   : > { %v571_v5 = vpop.xlane.xlu0 %570 }
 0x232   : > { %v572_v6 = vsub.f32 %v564_v45, %v571_v5 }
 0x234   : > { %v573_v7 = vmul.f32 1.442695, %v572_v6 }
 0x236   : > { %1276 = vpow2.f32 %v573_v7 }
 0x243   : > { %v1277_v8 = vpop.eup %1276 }
 0x244   : > { %v575_v9 = vsel %vm522_vm2, %v1277_v8, 0.0 }
 0x245   : > { %576 = vadd.xlane.f32.xlu1 %v575_v9 }
 0x256   : > { %582 = vrot.lane.b32.xlu1 %v1448_v26, %s1307_s15 }
 0x2a3   : > { %v684_v10 = vpop.xlane.xlu1 %683 }
 0x2a4   : > { %v685_v11 = vsub.f32 %v677_v51, %v684_v10 }
 0x2a6   : > { %v686_v12 = vmul.f32 1.442695, %v685_v11 }
 0x2a8   : > { %1278 = vpow2.f32 %v686_v12 }
 0x2ab   : > { %v794_v14 = vpop.xlane.xlu0 %793 }
 0x2ac   : > { %v795_v15 = vsub.f32 %v787_v57, %v794_v14 }
 0x2ae   : > { %v796_v16 = vmul.f32 1.442695, %v795_v15 }
 0x2b0   : > { %1280 = vpow2.f32 %v796_v16  ;;  %v1153_v16 = vld [vmem:[%s1549_s8] ss:$0 sm:$0xff] }
 0x2b3   : > { %v904_v17 = vpop.xlane.xlu0 %903 }
 0x2b4   : > { %v905_v18 = vsub.f32 %v897_v63, %v904_v17 }
 0x2b5   : > { %v1279_v19 = vpop.eup %1278 }
 0x2b6   : > { %v906_v20 = vmul.f32 1.442695, %v905_v18  ;;  %v688_v21 = vsel %vm522_vm2, %v1279_v19, 0.0 }
 0x2b7   : > { %689 = vadd.xlane.f32.xlu0 %v688_v21 }
 0x2b8   : > { %1282 = vpow2.f32 %v906_v20 }
 0x2bd   : > { %v1281_v22 = vpop.eup %1280 }
 0x2be   : > { %v798_v23 = vsel %vm522_vm2, %v1281_v22, 0.0 }
 0x2bf   : > { %799 = vadd.xlane.f32.xlu1 %v798_v23 }
 0x2c5   : > { %v1283_v24 = vpop.eup %1282 }
 0x2c6   : > { %v908_v25 = vsel %vm522_vm2, %v1283_v24, 0.0 }
 0x2c7   : > { %909 = vadd.xlane.f32.xlu0 %v908_v25 }
 0x2ce   : > { %v577_v27 = vpop.xlane.xlu1 %576 }
 0x2cf   : > { %1284 = vrcp.f32 %v577_v27 }
 0x2d0   : > { %804 = vrot.lane.b32.xlu1 %v1448_v26, %s1308_s16 }
 0x2d2   : > { %v583_v28 = vpop.permute.xlu1 %582 }
 0x2d3   : > { %v589_v29 = vsel %vm587_vm3, %v583_v28, 0 }
 0x2d4   : > { %1207 = vmatpush3.bf16.msra.mxu1 %v589_v29  ;;  %914 = vrot.lane.b32.xlu1 %v1448_v26, %s1309_s20 }
 0x2d5   : > { %1218 = vmatprep.subr.bf16.mxu1 %v1302_v3 }
 0x2dc   : > { %v1285_v30 = vpop.eup %1284 }
 0x2dd   : > { %694 = vrot.lane.b32.xlu0 %v1448_v26, %s1310_s21  ;;  %v579_v31 = vmul.f32 %v1285_v30, %v1277_v8 }
 0x2df   : > { %v580_v32 = vpack.c.bf16 %v579_v31, %v579_v31 }
 0x2e1   : > { %1209 = vmatmul.mubr.msk.bf16.vlgmr.msra.gmra.mxu1 %vm522_vm2, %v580_v32 }
 0x2e2   : > { %1220 = vmatprep.mubr.msk.bf16.mxu1 %vm1303_vm0, %v1302_v3 }
 0x340   : > { %v690_v33 = vpop.xlane.xlu0 %689 }
 0x341   : > { %1286 = vrcp.f32 %v690_v33 }
 0x348   : > { %v800_v34 = vpop.xlane.xlu1 %799 }
 0x349   : > { %1288 = vrcp.f32 %v800_v34 }
 0x34c   : > { %v805_v40 = vpop.permute.xlu1 %804 }
 0x34d   : > { %v810_v42 = vsel %vm587_vm3, %v805_v40, 0 }
 0x34e   : > { %v1287_v35 = vpop.eup %1286 }
 0x34f   : > { %v692_v37 = vmul.f32 %v1287_v35, %v1279_v19  ;;  %v1156_v35 = vld [vmem:[%s1551_s10] ss:$0 sm:$0xff] }
 0x350   : > { %v910_v36 = vpop.xlane.xlu0 %909  ;;  %v915_v44 = vpop.permute.xlu1 %914 }
 0x351   : > { %1290 = vrcp.f32 %v910_v36  ;;  %v693_v26 = vpack.c.bf16 %v692_v37, %v692_v37  ;;  %v920_v47 = vsel %vm587_vm3, %v915_v44, 0 }
 0x354   : > { %v695_v38 = vpop.permute.xlu0 %694 }
 0x355   : > { %v700_v39 = vsel %vm587_vm3, %v695_v38, 0 }
 0x356   : > { %1219 = vmatpush3.bf16.msra.mxu1 %v700_v39  ;;  %v1289_v41 = vpop.eup %1288 }
 0x357   : > { %1230 = vmatprep.subr.bf16.mxu1 %v1302_v3  ;;  %v802_v43 = vmul.f32 %v1289_v41, %v1281_v22 }
 0x359   : > { %1221 = vmatmul.mubr.msk.bf16.vlgmr.msra.gmra.mxu1 %vm522_vm2, %v693_v26  ;;  %v803_v45 = vpack.c.bf16 %v802_v43, %v802_v43 }
 0x35a   : > { %1231 = vmatpush3.bf16.msra.mxu1 %v810_v42  ;;  %1232 = vmatprep.mubr.msk.bf16.mxu1 %vm1303_vm0, %v1302_v3 }
 0x35b   : > { %1242 = vmatprep.subr.bf16.mxu1 %v1302_v3 }
 0x35e   : > { %v1291_v46 = vpop.eup %1290 }
 0x35f   : > { %v912_v48 = vmul.f32 %v1291_v46, %v1283_v24 }
 0x361   : > { %1233 = vmatmul.mubr.msk.bf16.vlgmr.msra.gmra.mxu1 %vm522_vm2, %v803_v45  ;;  %v913_v49 = vpack.c.bf16 %v912_v48, %v912_v48 }
 0x362   : > { %1243 = vmatpush3.bf16.msra.mxu1 %v920_v47  ;;  %1244 = vmatprep.mubr.msk.bf16.mxu1 %vm1303_vm0, %v1302_v3 }
 0x369   : > { %1245 = vmatmul.mubr.msk.bf16.vlgmr.msra.gmra.mxu1 %vm522_vm2, %v913_v49 }
 0x3a1   : > { %v625_v50 = vpop.f32.mrf.mxu1 }
 0x3a3   : > { %v1210_v51 = vpop.f32.mrf.mxu1 }
 0x3a5   : > { %v628_v52 = vpop.f32.mrf.mxu1 }
 0x3a7   : > { %v1211_v53 = vpop.f32.mrf.mxu1 }
 0x419   : > { %v736_v57 = vpop.f32.mrf.mxu1 }
 0x41a   : > { %963 = vrot.lane.b32.xlu0 %v736_v57, %s1311_s18 }
 0x41b   : > { %v1222_v58 = vpop.f32.mrf.mxu1 }
 0x41d   : > { %v739_v62 = vpop.f32.mrf.mxu1 }
 0x41f   : > { %v1223_v63 = vpop.f32.mrf.mxu1 }
 0x421   : > { %v846_v0 = vpop.f32.mrf.mxu1 }
 0x422   : > { %967 = vrot.lane.b32.xlu1 %v846_v0, %s1312_s30 }
 0x423   : > { %v1234_v1 = vpop.f32.mrf.mxu1 }
 0x425   : > { %v849_v3 = vpop.f32.mrf.mxu1 }
 0x427   : > { %v1235_v2 = vpop.f32.mrf.mxu1 }
 0x429   : > { %v956_v4 = vpop.f32.mrf.mxu1 }
 0x42a   : > { %971 = vrot.lane.b32.xlu0 %v956_v4, %s1313_s12 }
 0x42b   : > { %v1246_v5 = vpop.f32.mrf.mxu1 }
 0x42d   : > { %v959_v6 = vpop.f32.mrf.mxu1 }
 0x42f   : > { %v1247_v7 = vpop.f32.mrf.mxu1 }
 0x48c   : > { %v964_v8 = vpop.permute.xlu0 %963 }
 0x48d   : > { %v974_v10 = vsel %vm522_vm2, %v625_v50, %v964_v8 }
 0x494   : > { %v968_v9 = vpop.permute.xlu1 %967 }
 0x495   : > { %v976_v11 = vsel %vm975_vm4, %v974_v10, %v968_v9 }
 0x49c   : > { %v972_v12 = vpop.permute.xlu0 %971 }
 0x49d   : > { %v978_v14 = vsel %vm977_vm5, %v976_v11, %v972_v12 }
 0x49e   : > { %v983_v15 = vpack.c.bf16 %v978_v14, %v978_v14 }
 0x4a0   : > { %1253 = vmatmul.mubr.msk.bf16.vlgmr.msra.gmra.mxu0 %vm417_vm1, %v983_v15 }
 0x560   : > { %v1030_v17 = vpop.f32.mrf.mxu0 }
 0x561   : > { %v1031_v18 = vadd.f32 %v1153_v16, %v1030_v17 }
 0x562   : > { %v1254_v19 = vpop.f32.mrf.mxu0 }
 0x563   : > { %v1038_v20 = vadd.f32 %v1031_v18, %v1426_v13  ;;  %v1155_v13 = vld [vmem:[%s1550_s9] ss:$0 sm:$0xff] }
 0x564   : > { %v1033_v21 = vpop.f32.mrf.mxu0 }
 0x565   : > { %v1039_v22 = vsel %vm417_vm1, %v1038_v20, 0.0 }
 0x566   : > { %1040 = vadd.xlane.f32.xlu1 %v1039_v22  ;;  %v1255_v23 = vpop.f32.mrf.mxu0 }
 0x5ef   : > { %v1041_v24 = vpop.xlane.xlu1 %1040 }
 0x5f0   : > { %v1043_v25 = vmul.f32 0.03125, %v1041_v24 }
 0x5f2   : > { %v1044_v27 = vsub.f32 %v1038_v20, %v1043_v25 }
 0x5f4   : > { %v1045_v28 = vmul.f32 %v1044_v27, %v1044_v27 }
 0x5f6   : > { %v1046_v29 = vsel %vm417_vm1, %v1045_v28, 0.0 }
 0x5f7   : > { %1047 = vadd.xlane.f32.xlu0 %v1046_v29 }
 0x680   : > { %v1048_v30 = vpop.xlane.xlu0 %1047 }
 0x681   : > { %v1049_v31 = vmul.f32 0.03125, %v1048_v30 }
 0x683   : > { %v1050_v32 = vadd.f32 1e-05, %v1049_v31 }
 0x685   : > { %1292 = vrsqrt.f32 %v1050_v32 }
 0x692   : > { %v1293_v33 = vpop.eup %1292 }
 0x693   : > { %v1052_v34 = vmul.f32 %v1293_v33, %v1044_v27 }
 0x695   : > { %v1059_v36 = vmul.f32 %v1155_v13, %v1052_v34 }
 0x697   : > { %v1066_v37 = vadd.f32 %v1156_v35, %v1059_v36 }
 0x699   : > { %1067 = vst.msk [vmem:[%s398_s24] sm:$0xff] %vm417_vm1, %v1066_v37 }
 0x69a PF: > { %s21_s17 = sadd.s32 1, %s1300_s17  }
 0x69b   : > { %p18_p4 = scmp.ge.s32.totalorder %s21_s17, 4  }
 0x69d   :  { %20 = sbr.rel (!%p18_p4) target bundleno = 1 (0x1), region = 97 }

// kernel: decoder_forward.10
= control target key start
LH: loop header
LB: loop body
LE: loop exit
PB: predicated region body
PF: predicated region fallthrough
CT: control target
= control target key end

     0   :  { %s589_s24 = smov 0   ;;  %s665_s0 = inlined_call_operand.vmem [shape: f32[2,8,32], index: 0, kind: input, shape index: {}]   ;;  %s666_s1 = inlined_call_operand.vmem [shape: f32[32,64], index: 1, kind: input, shape index: {}]   ;;  %s667_s2 = inlined_call_operand.vmem [shape: f32[1,64], index: 2, kind: input, shape index: {}]   ;;  %s668_s3 = inlined_call_operand.vmem [shape: f32[64,32], index: 3, kind: input, shape index: {}]   ;;  %s669_s4 = inlined_call_operand.vmem [shape: f32[1,32], index: 4, kind: input, shape index: {}]   ;;  %s670_s5 = inlined_call_operand.vmem [shape: f32[1,32], index: 5, kind: input, shape index: {}]   ;;  %s671_s6 = inlined_call_operand.vmem [shape: f32[1,32], index: 6, kind: input, shape index: {}]   ;;  %s672_s7 = inlined_call_operand.vmem [shape: f32[2,8,32], index: 7, kind: output, shape index: {}]  }
   0x1 LB: > { %s484_s25 = sadd.s32 4294967295, %s545_s24   ;;  %p488_p0 = scmp.ge.s32.totalorder %s545_s24, 1  ;;  %s545_s24 = sphi %s589_s24, %s17_s24  }
   0x2   : > { %p236_p1 = scmp.lt.s32.totalorder %s545_s24, 3 }
   0x4   : > { %p237_p2 = pnand %p488_p0, %p236_p1 }
   0x5   : > { %p266_p3 = scmp.lt.s32.totalorder (!%p237_p2), %s484_s25, 1 }
   0x6   : > { %240 = sbr.rel (%p237_p2) target bundleno = 726 (0x2d6), region = 48 }
   0xb   : > { %v278_v0 = vld [vmem:[%s666_s1 + $0x10] sm:$0xff]  ;;  %v279_v1 = vld [vmem:[%s666_s1 + $0x18] sm:$0xff]  ;;  %v276_v2 = vld [vmem:[%s666_s1] sm:$0xff]  ;;  %v547_v3 = vmov 0.0   ;;  %vm548_vm0 = vmmov 0   ;;  %s674_s25 = smov (!%p266_p3, %s484_s25), 1 }
   0xc   : > { %507 = vmatprep.subr.bf16.mxu0 %v547_v3  ;;  %v282_v4 = vpack.c.bf16 %v279_v1, %v278_v0  ;;  %v277_v5 = vld [vmem:[%s666_s1 + $0x8] sm:$0xff]  ;;  %511 = vmatprep.mubr.msk.bf16.mxu0 %vm548_vm0, %v547_v3  ;;  %v341_v6 = vld [vmem:[%s668_s3 + $0x30] sm:$0xff]  ;;  %v342_v7 = vld [vmem:[%s668_s3 + $0x38] sm:$0xff]  ;;  %s489_s19 = sshll.u32 %s674_s25, 3  ;;  %vm290_vm1 = vcmask 261120   ;;  %vm355_vm2 = vcmask 523264  }
   0xd   : > { %515 = vmatprep.subr.bf16.mxu1 %v547_v3  ;;  %v347_v8 = vpack.c.bf16 %v342_v7, %v341_v6  ;;  %v339_v9 = vld [vmem:[%s668_s3 + $0x20] sm:$0xff]  ;;  %v340_v10 = vld [vmem:[%s668_s3 + $0x28] sm:$0xff]  ;;  %523 = vmatprep.mubr.msk.bf16.mxu1 %vm548_vm0, %v547_v3  ;;  %v281_v11 = vpack.c.bf16 %v277_v5, %v276_v2  ;;  %s269_s22 = scalar_lea.vmem %s665_s0, %s489_s19  ;;  %v337_v15 = vld [vmem:[%s668_s3 + $0x10] sm:$0xff]  ;;  %s273_s21 = scalar_lea.vmem %s672_s7, %s489_s19 }
   0xe   : > { %508 = vmatpush3.bf16.msra.mxu0 %v282_v4  ;;  %v346_v12 = vpack.c.bf16 %v340_v10, %v339_v9  ;;  %v275_v13 = vld [vmem:[%s269_s22] sm:$0xff]  ;;  %v338_v16 = vld [vmem:[%s668_s3 + $0x18] sm:$0xff]  ;;  %v336_v19 = vld [vmem:[%s668_s3 + $0x8] sm:$0xff] }
   0xf   : > { %509 = vmatprep.subr.bf16.mxu0 %v547_v3  ;;  %516 = vmatpush3.bf16.msra.mxu1 %v347_v8  ;;  %v280_v14 = vpack.c.bf16 %v275_v13, %v275_v13  ;;  %v345_v17 = vpack.c.bf16 %v338_v16, %v337_v15  ;;  %v335_v18 = vld [vmem:[%s668_s3] sm:$0xff] }
  0x10   : > { %517 = vmatprep.subr.bf16.mxu1 %v547_v3  ;;  %v344_v20 = vpack.c.bf16 %v336_v19, %v335_v18  ;;  %v491_v21 = vld [vmem:[%s667_s2] ss:$0 sm:$0xff] }
  0x11   : > { %v493_v29 = vld [vmem:[%s669_s4] ss:$0 sm:$0xff] }
  0x12   : > { %510 = vmatpush3.bf16.msra.mxu0 %v281_v11  ;;  %v495_v46 = vld [vmem:[%s670_s5] ss:$0 sm:$0xff] }
  0x13   : > { %518 = vmatpush3.bf16.msra.mxu1 %v346_v12  ;;  %v496_v48 = vld [vmem:[%s671_s6] ss:$0 sm:$0xff] }
  0x14   : > { %519 = vmatprep.subr.bf16.mxu1 %v547_v3 }
  0x15   : > { %512 = vmatmul.mubr.msk.bf16.vlgmr.msra.gmra.mxu0 %vm290_vm1, %v280_v14 }
  0x17   : > { %520 = vmatpush3.bf16.msra.mxu1 %v345_v17 }
  0x18   : > { %521 = vmatprep.subr.bf16.mxu1 %v547_v3 }
  0x1b   : > { %522 = vmatpush3.bf16.msra.mxu1 %v344_v20 }
  0xd5   : > { %v328_v22 = vpop.f32.mrf.mxu0 }
  0xd6   : > { %v329_v23 = vadd.f32 %v491_v21, %v328_v22 }
  0xd7   : > { %v513_v24 = vpop.f32.mrf.mxu0 }
  0xd8   : > { %v334_v25 = vmax.f32 %v329_v23, 0.0 }
  0xd9   : > { %v331_v26 = vpop.f32.mrf.mxu0 }
  0xda   : > { %v343_v27 = vpack.c.bf16 %v334_v25, %v334_v25 }
  0xdb   : > { %v514_v28 = vpop.f32.mrf.mxu0 }
  0xdc   : > { %524 = vmatmul.mubr.msk.bf16.vlgmr.msra.gmra.mxu1 %vm355_vm2, %v343_v27 }
 0x19c   : > { %v393_v30 = vpop.f32.mrf.mxu1 }
 0x19d   : > { %v394_v31 = vadd.f32 %v493_v29, %v393_v30 }
 0x19e   : > { %v525_v32 = vpop.f32.mrf.mxu1 }
 0x19f   : > { %v401_v33 = vadd.f32 %v394_v31, %v275_v13 }
 0x1a0   : > { %v396_v34 = vpop.f32.mrf.mxu1 }
 0x1a1   : > { %v402_v35 = vsel %vm290_vm1, %v401_v33, 0.0 }
 0x1a2   : > { %403 = vadd.xlane.f32.xlu0 %v402_v35  ;;  %v526_v36 = vpop.f32.mrf.mxu1 }
 0x22b   : > { %v404_v37 = vpop.xlane.xlu0 %403 }
 0x22c   : > { %v406_v38 = vmul.f32 0.03125, %v404_v37 }
 0x22e   : > { %v407_v39 = vsub.f32 %v401_v33, %v406_v38 }
 0x230   : > { %v408_v40 = vmul.f32 %v407_v39, %v407_v39 }
 0x232   : > { %v409_v41 = vsel %vm290_vm1, %v408_v40, 0.0 }
 0x233   : > { %410 = vadd.xlane.f32.xlu0 %v409_v41 }
 0x2bc   : > { %v411_v42 = vpop.xlane.xlu0 %410 }
 0x2bd   : > { %v412_v43 = vmul.f32 0.03125, %v411_v42 }
 0x2bf   : > { %v413_v44 = vadd.f32 1e-05, %v412_v43 }
 0x2c1   : > { %537 = vrsqrt.f32 %v413_v44 }
 0x2ce   : > { %v538_v45 = vpop.eup %537 }
 0x2cf   : > { %v415_v47 = vmul.f32 %v538_v45, %v407_v39 }
 0x2d1   : > { %v422_v49 = vmul.f32 %v495_v46, %v415_v47 }
 0x2d3   : > { %v429_v50 = vadd.f32 %v496_v48, %v422_v49 }
 0x2d5   : > { %430 = vst.msk [vmem:[%s273_s21] sm:$0xff] %vm290_vm1, %v429_v50 }
 0x2d6 PF: > { %s17_s24 = sadd.s32 1, %s545_s24  }
 0x2d7   : > { %p14_p4 = scmp.ge.s32.totalorder %s17_s24, 4  }
 0x2d9   :  { %16 = sbr.rel (!%p14_p4) target bundleno = 1 (0x1), region = 78 }

// kernel: decoder_forward.13
= control target key start
LH: loop header
LB: loop body
LE: loop exit
PB: predicated region body
PF: predicated region fallthrough
CT: control target
= control target key end

     0   :  { %12 = vsyncpa [#allocation3], 0  ;;  %s835_s0 = inlined_call_operand.vmem [shape: f32[2,8,32], index: 0, kind: input, shape index: {}]   ;;  %s836_s1 = inlined_call_operand.vmem [shape: f32[32,64], index: 1, kind: input, shape index: {}]   ;;  %s837_s2 = inlined_call_operand.vmem [shape: f32[1,64], index: 2, kind: input, shape index: {}]   ;;  %s838_s3 = inlined_call_operand.vmem [shape: f32[64,32], index: 3, kind: input, shape index: {}]   ;;  %s839_s4 = inlined_call_operand.vmem [shape: f32[1,32], index: 4, kind: input, shape index: {}]   ;;  %s840_s5 = inlined_call_operand.vmem [shape: f32[1,32], index: 5, kind: input, shape index: {}]   ;;  %s841_s6 = inlined_call_operand.vmem [shape: f32[1,32], index: 6, kind: input, shape index: {}]   ;;  %s842_s7 = inlined_call_operand.hbm [shape: f32[2,8,32], index: 7, kind: output, shape index: {}]  }
   0x1   :  { %14 = vsyncpa [#allocation3 + $0x1], 0  ;;  %s696_s24 = smov 0   ;;  %s698_s25 = smov 0  }
   0x2   :  { %s700_s26 = smov 0   ;;  %s702_s27 = smov 0  }
   0x3 LB: > { %s717_s28 = sadd.s32 4294967295, %s651_s27   ;;  %s504_s29 = sadd.s32 4294967294, %s651_s27   ;;  %s651_s27 = sphi %s702_s27, %s848_s27   ;;  %s647_s26 = sphi %s700_s26, %s847_s26   ;;  %s643_s25 = sphi %s698_s25, %s846_s25   ;;  %s639_s24 = sphi %s696_s24, %s845_s24  }
   0x4   : > { %s721_s30 = sadd.s32 1, %s651_s27   ;;  %s179_s8 = sadd.s32 1, %s647_s26 }
   0x5   : > { %s176_s9 = ssub.s32 %s651_s27, %s721_s30  ;;  %p189_p0 = scmp.ne.s32.totalorder %s647_s26, %s643_s25 }
   0x6   : > { %p177_p1 = scmp.eq.s32.totalorder %s176_s9, 0  ;;  %p190_p2 = scmp.eq.s32.totalorder %s717_s28, 1 }
   0x7   : > { %p195_p3 = scmp.ne.s32.totalorder %s643_s25, %s639_s24  ;;  %p196_p4 = scmp.eq.s32.totalorder %s504_s29, 1 }
   0x8   : > { %s732_s10 = scalar_select %p177_p1, %s647_s26, %s179_s8  }
   0x9   : > { %p734_p5 = por %p190_p2, %p189_p0  ;;  %p738_p6 = por %p196_p4, %p195_p3 }
   0xa   : > { %p507_p7 = scmp.ge.s32.totalorder %s651_s27, 1  ;;  %p239_p8 = scmp.lt.s32.totalorder %s651_s27, 3 }
   0xc   : > { %p240_p9 = pnand %p507_p7, %p239_p8 }
   0xd   : > { %p270_p10 = scmp.lt.s32.totalorder (!%p240_p9), %s717_s28, 1  ;;  %s267_s18 = sand.u32 (!%p240_p9), 1, %s643_s25  }
   0xe   : > { %243 = sbr.rel (%p240_p9) target bundleno = 746 (0x2ea), region = 48  ;;  %s517_s29 = sshll.u32 (!%p240_p9), %s717_s28, 7 }
   0xf   : > { %s443_s15 = scalar_lea.hbm (!%p240_p9), %s842_s7, %s517_s29  ;;  %s655_s20 = smov (!%p240_p9), [#allocation2]  }
  0x10   : > { %s595_s21 = sshll.u32 (!%p240_p9), %s655_s20, 4  ;;  %s596_s21 = int_to_ptr.vmem [resolvable:$false] %s595_s21 }
  0x13   : > { %v278_v0 = vld [vmem:[%s836_s1 + $0x10] sm:$0xff]  ;;  %v279_v1 = vld [vmem:[%s836_s1 + $0x18] sm:$0xff]  ;;  %v276_v2 = vld [vmem:[%s836_s1] sm:$0xff]  ;;  %v653_v3 = vmov 0.0   ;;  %vm654_vm0 = vmmov 0   ;;  %s271_s8 = scalar_select %p270_p10, %s717_s28, 1 }
  0x14   : > { %528 = vmatprep.subr.bf16.mxu0 %v653_v3  ;;  %v282_v4 = vpack.c.bf16 %v279_v1, %v278_v0  ;;  %v277_v5 = vld [vmem:[%s836_s1 + $0x8] sm:$0xff]  ;;  %532 = vmatprep.mubr.msk.bf16.mxu0 %vm654_vm0, %v653_v3  ;;  %v341_v6 = vld [vmem:[%s838_s3 + $0x30] sm:$0xff]  ;;  %v342_v7 = vld [vmem:[%s838_s3 + $0x38] sm:$0xff]  ;;  %vm290_vm1 = vcmask 261120   ;;  %vm355_vm2 = vcmask 523264   ;;  %s597_s28 = scalar_lea.vmem %s596_s21, 256 }
  0x15   : > { %536 = vmatprep.subr.bf16.mxu1 %v653_v3  ;;  %v347_v8 = vpack.c.bf16 %v342_v7, %v341_v6  ;;  %v339_v9 = vld [vmem:[%s838_s3 + $0x20] sm:$0xff]  ;;  %v340_v10 = vld [vmem:[%s838_s3 + $0x28] sm:$0xff]  ;;  %544 = vmatprep.mubr.msk.bf16.mxu1 %vm654_vm0, %v653_v3  ;;  %v281_v11 = vpack.c.bf16 %v277_v5, %v276_v2  ;;  %s509_s16 = sshll.u32 %s271_s8, 3  ;;  %v337_v15 = vld [vmem:[%s838_s3 + $0x10] sm:$0xff] }
  0x16   : > { %529 = vmatpush3.bf16.msra.mxu0 %v282_v4  ;;  %v346_v12 = vpack.c.bf16 %v340_v10, %v339_v9  ;;  %s273_s19 = scalar_lea.vmem %s835_s0, %s509_s16  ;;  %v338_v16 = vld [vmem:[%s838_s3 + $0x18] sm:$0xff]  ;;  %v335_v18 = vld [vmem:[%s838_s3] sm:$0xff]  ;;  %v336_v19 = vld [vmem:[%s838_s3 + $0x8] sm:$0xff]  ;;  %s432_s16 = scalar_lea.sflag [#allocation3], %s267_s18 }
  0x17   : > { %530 = vmatprep.subr.bf16.mxu0 %v653_v3  ;;  %537 = vmatpush3.bf16.msra.mxu1 %v347_v8  ;;  %v275_v13 = vld [vmem:[%s273_s19] sm:$0xff]  ;;  %v345_v17 = vpack.c.bf16 %v338_v16, %v337_v15  ;;  %v344_v20 = vpack.c.bf16 %v336_v19, %v335_v18  ;;  %s508_s19 = sshll.u32 %s267_s18, 3 }
  0x18   : > { %538 = vmatprep.subr.bf16.mxu1 %v653_v3  ;;  %v280_v14 = vpack.c.bf16 %v275_v13, %v275_v13  ;;  %v510_v21 = vld [vmem:[%s837_s2] ss:$0 sm:$0xff]  ;;  %s269_s8 = scalar_lea.vmem [#allocation2], %s508_s19 }
  0x19   : > { %v512_v29 = vld [vmem:[%s839_s4] ss:$0 sm:$0xff]  ;;  %s445_s9 = sshll.u32 %s269_s8, 4  ;;  %s446_s9 = int_to_ptr.vmem [resolvable:$true] %s445_s9 }
  0x1a   : > { %531 = vmatpush3.bf16.msra.mxu0 %v281_v11  ;;  %v514_v46 = vld [vmem:[%s840_s5] ss:$0 sm:$0xff]  ;;  %s591_s17 = scalar_lea.vmem %s446_s9, 128  ;;  %p598_p0 = scmp.lt.s32.totalorder %s446_s9, %s596_s21 }
  0x1b   : > { %539 = vmatpush3.bf16.msra.mxu1 %v346_v12  ;;  %v515_v48 = vld [vmem:[%s841_s6] ss:$0 sm:$0xff]  ;;  %p592_p11 = scmp.ne.s32.totalorder %s446_s9, %s591_s17  ;;  %p599_p1 = scmp.lt.s32.totalorder %s597_s28, %s591_s17 }
  0x1c   : > { %540 = vmatprep.subr.bf16.mxu1 %v653_v3 }
  0x1d   : > { %533 = vmatmul.mubr.msk.bf16.vlgmr.msra.gmra.mxu0 %vm290_vm1, %v280_v14  ;;  %p593_p12 = pnand %p592_p11, %p734_p5  ;;  %p600_p2 = por %p599_p1, %p598_p0 }
  0x1f   : > { %541 = vmatpush3.bf16.msra.mxu1 %v345_v17  ;;  %p594_p13 = pneg %p593_p12 }
  0x20   : > { %542 = vmatprep.subr.bf16.mxu1 %v653_v3 }
  0x21   : > { %p601_p3 = pnand %p600_p2, %p594_p13 }
  0x23   : > { %543 = vmatpush3.bf16.msra.mxu1 %v344_v20 }
  0xdd   : > { %v328_v22 = vpop.f32.mrf.mxu0 }
  0xde   : > { %v329_v23 = vadd.f32 %v510_v21, %v328_v22 }
  0xdf   : > { %v534_v24 = vpop.f32.mrf.mxu0 }
  0xe0   : > { %v334_v25 = vmax.f32 %v329_v23, 0.0 }
  0xe1   : > { %v331_v26 = vpop.f32.mrf.mxu0 }
  0xe2   : > { %v343_v27 = vpack.c.bf16 %v334_v25, %v334_v25 }
  0xe3   : > { %v535_v28 = vpop.f32.mrf.mxu0 }
  0xe4   : > { %545 = vmatmul.mubr.msk.bf16.vlgmr.msra.gmra.mxu1 %vm355_vm2, %v343_v27 }
 0x1a4   : > { %v393_v30 = vpop.f32.mrf.mxu1 }
 0x1a5   : > { %v394_v31 = vadd.f32 %v512_v29, %v393_v30 }
 0x1a6   : > { %v546_v32 = vpop.f32.mrf.mxu1 }
 0x1a7   : > { %v401_v33 = vadd.f32 %v394_v31, %v275_v13 }
 0x1a8   : > { %v396_v34 = vpop.f32.mrf.mxu1 }
 0x1a9   : > { %v402_v35 = vsel %vm290_vm1, %v401_v33, 0.0 }
 0x1aa   : > { %403 = vadd.xlane.f32.xlu0 %v402_v35  ;;  %v547_v36 = vpop.f32.mrf.mxu1 }
 0x233   : > { %v404_v37 = vpop.xlane.xlu0 %403 }
 0x234   : > { %v406_v38 = vmul.f32 0.03125, %v404_v37 }
 0x236   : > { %v407_v39 = vsub.f32 %v401_v33, %v406_v38 }
 0x238   : > { %v408_v40 = vmul.f32 %v407_v39, %v407_v39 }
 0x23a   : > { %v409_v41 = vsel %vm290_vm1, %v408_v40, 0.0 }
 0x23b   : > { %410 = vadd.xlane.f32.xlu0 %v409_v41 }
 0x2c4   : > { %v411_v42 = vpop.xlane.xlu0 %410 }
 0x2c5   : > { %v412_v43 = vmul.f32 0.03125, %v411_v42 }
 0x2c7   : > { %v413_v44 = vadd.f32 1e-05, %v412_v43 }
 0x2c9   : > { %589 = vrsqrt.f32 %v413_v44 }
 0x2d6   : > { %v590_v45 = vpop.eup %589 }
 0x2d7   : > { %v415_v47 = vmul.f32 %v590_v45, %v407_v39 }
 0x2d9   : > { %v422_v49 = vmul.f32 %v514_v46, %v415_v47 }
 0x2db   : > { %v429_v50 = vadd.f32 %v515_v48, %v422_v49 }
 0x2dd   : > { %430 = vst.msk [vmem:[%s269_s8] sm:$0xff] %vm290_vm1, %v429_v50 }
 0x2de   : > { %604 = shalt.err (!%p601_p3)
}
 0x2df   : > { %s605_s19 = scalar_lea.hbm %s443_s15, 128  ;;  %s609_s23 = scalar_lea.hbm %s842_s7, 256 }
 0x2e0   : > { %p606_p4 = scmp.ne.s32.totalorder %s443_s15, %s605_s19  ;;  %p610_p9 = scmp.lt.s32.totalorder %s443_s15, %s842_s7 }
 0x2e1   : > { %p611_p10 = scmp.lt.s32.totalorder %s609_s23, %s605_s19 }
 0x2e2   : > { %p607_p7 = pnand %p606_p4, %p734_p5 }
 0x2e3   : > { %p612_p11 = por %p611_p10, %p610_p9 }
 0x2e4   : > { %p608_p8 = pneg %p607_p7 }
 0x2e6   : > { %p613_p12 = pnand %p612_p11, %p608_p8 }
 0x2e8   : > { %616 = shalt.err (!%p613_p12)
}
 0x2e9   : > { %548 = dma.vmem_to_hbm [thread:$0]  (%p734_p5), %s446_s9, 128, %s443_s15, %s432_s16  }
 0x2ea PF: > { %p554_p13 = scmp.ge.s32.totalorder %s651_s27, 2  ;;  %s457_s13 = sand.u32 1, %s639_s24  }
 0x2eb   : > { %s458_s14 = scalar_lea.sflag [#allocation3], %s457_s13 }
 0x2ec   : > { %p551_p0 = pnand %p554_p13, %p738_p6 }
 0x2ee   : > { %p552_p1 = pneg %p551_p0 }
 0x2f0   : > { %634 = dma.done.wait (%p552_p1), %s458_s14, 128  }
 0x2f1   : > { %636 = vsyncadd (%p552_p1), %s458_s14, 4294967168  ;;  %p17_p2 = scmp.ge.s32.totalorder %s721_s30, 4   ;;  %s845_s24 = smov %s643_s25 }
 0x2f2   : > { %s846_s25 = smov %s647_s26  ;;  %s847_s26 = smov %s732_s10 }
 0x2f3   : > { %s848_s27 = smov %s721_s30  ;;  %19 = sbr.rel (!%p17_p2) target bundleno = 3 (0x3), region = 83 }
 0x2f8   :  { %463 = vsyncpa [#allocation3], 1 }
 0x2f9   :  { %465 = vsyncpa [#allocation3 + $0x1], 1 }

</bundles_post_ra>
